<compile_context>
chip_gen: v7x
topology: tpu7x:2x2x1
jax: 0.10.0
libtpu: 0.0.40
codegen_flags: <defaults>
</compile_context>

<pallas_src>
import jax
import jax.numpy as jnp
from jax import lax
from jax.experimental import pallas as pl
from jax.experimental.pallas import tpu as pltpu


def _round_up(x, m):
    return (x + m - 1) // m * m


def _make_kernel(Np, Cp, Cip, tq, n_valid):
    """Builds the non-local kernel body (closes over static padded sizes)."""

    def kernel(x_ref,        # (1, Np, Cp)   bf16 input (full row block per batch)
               w_all_ref,    # (Cp, 3*Cip)   bf16 fused theta|phi|g weights
               b_all_ref,    # (1, 3*Cip)    f32  fused biases
               ww_ref,       # (Cip, Cp)     bf16 W weight (BN folded in)
               bw_ref,       # (1, Cp)       f32  folded bias
               wy_ref,       # out (1, tq, Cp)  f32
               nl_ref,       # out (1, tq, Np)  f32
               th_sc,        # (Np, Cip) bf16 scratch (resident per batch)
               ph_sc,        # (Np, Cip) bf16 scratch
               g_sc):        # (Np, Cip) bf16 scratch
        qi = pl.program_id(1)

        # ---- once per batch: fused theta/phi/g projections over all N ----
        @pl.when(qi == 0)
        def _():
            x = x_ref[0]                                            # (Np, Cp) bf16
            proj = jnp.dot(x, w_all_ref[...],
                           preferred_element_type=jnp.float32)      # (Np, 3*Cip)
            proj = (proj + b_all_ref[...]).astype(jnp.bfloat16)
            th_sc[...] = proj[:, 0 * Cip:1 * Cip]
            ph_sc[...] = proj[:, 1 * Cip:2 * Cip]
            g_sc[...] = proj[:, 2 * Cip:3 * Cip]

        # ---- per q-tile attention ----
        q_start = pl.multiple_of(qi * tq, tq)
        th_q = th_sc[pl.ds(q_start, tq), :]                          # (tq, Cip) bf16

        # f = theta_q @ phi^T, contracting last dims (no explicit transpose).
        f = lax.dot_general(th_q, ph_sc[...],
                            dimension_numbers=(((1,), (1,)), ((), ())),
                            preferred_element_type=jnp.float32)      # (tq, Np)

        if Np != n_valid:  # static check: mask padded key columns
            col = lax.broadcasted_iota(jnp.int32, (tq, Np), 1)
            f = jnp.where(col < n_valid, f, -jnp.inf)

        # numerically-stable softmax; reciprocal goes to the EUP slot.
        f_max = jnp.max(f, axis=-1, keepdims=True)
        e = jnp.exp(f - f_max)
        denom = jnp.sum(e, axis=-1, keepdims=True)
        inv = pl.reciprocal(denom, approx=True)
        p = e * inv                                                  # (tq, Np) f32

        # y = softmax(f) @ g ; W + folded BN.
        y = jnp.dot(p.astype(jnp.bfloat16), g_sc[...],
                    preferred_element_type=jnp.float32)              # (tq, Cip)
        wy = jnp.dot(y.astype(jnp.bfloat16), ww_ref[...],
                     preferred_element_type=jnp.float32) + bw_ref[...]  # (tq, Cp)

        wy_ref[0] = wy
        nl_ref[0] = p   # nl_map is part of the module's return signature

    return kernel


def nonlocal_block_2d(x_nchw, params, *, tq=128):
    """x_nchw: (B, Cin, H, W) f32.  Returns (W_y (B,Cin,H,W), nl_map (B,N,N))."""
    B, Cin, H, W = x_nchw.shape
    N = H * W
    Ci = params["wg"].shape[1]
    eps = 1e-5

    # ---- host-side folding of eval-mode BatchNorm + W bias ----
    scale = params["bn_gamma"] / jnp.sqrt(params["bn_var"] + eps)            # (Cin,)
    ww_f = params["ww"] * scale[None, :]                                     # (Ci, Cin)
    bw_f = (params["bw"] - params["bn_mean"]) * scale + params["bn_beta"]    # (Cin,)

    # ---- pad to lane/sublane friendly sizes ----
    Cp = _round_up(Cin, 128)
    Cip = _round_up(Ci, 128)
    Np = _round_up(N, max(tq, 128))
    tq = min(tq, Np)
    QT = Np // tq

    def pad2(a, r, c):
        return jnp.pad(a, ((0, r - a.shape[0]), (0, c - a.shape[1])))

    def pad1(a, c):
        return jnp.pad(a, ((0, c - a.shape[0]),))

    # Fuse theta|phi|g weights/biases (zero padding keeps the math exact).
    w_all = jnp.concatenate([pad2(params["wt"], Cp, Cip),
                             pad2(params["wp"], Cp, Cip),
                             pad2(params["wg"], Cp, Cip)], axis=1)
    w_all = w_all.astype(jnp.bfloat16)                                       # (Cp, 3Cip)
    b_all = jnp.concatenate([pad1(params["bt"], Cip),
                             pad1(params["bp"], Cip),
                             pad1(params["bg"], Cip)])[None, :].astype(jnp.float32)

    ww_p = pad2(ww_f, Cip, Cp).astype(jnp.bfloat16)                          # (Cip, Cp)
    bw_p = pad1(bw_f, Cp)[None, :].astype(jnp.float32)                       # (1, Cp)

    # NCHW -> (B, Np, Cp), bf16 for the MXU (halves HBM traffic and VMEM).
    x_flat = jnp.transpose(x_nchw.reshape(B, Cin, N), (0, 2, 1))
    x_flat = jnp.pad(x_flat, ((0, 0), (0, Np - N), (0, Cp - Cin)))
    x_flat = x_flat.astype(jnp.bfloat16)

    kernel = _make_kernel(Np, Cp, Cip, tq, N)

    # VMEM budget: double-buffered blocks + resident scratch + temporaries.
    est = (2 * Np * Cp * 2                         # x block (bf16)
           + 2 * (tq * Cp + tq * Np) * 4           # output blocks (f32)
           + 2 * (Cp * 3 * Cip + Cip * Cp) * 2     # weights (bf16)
           + 2 * (3 * Cip + Cp) * 4                # biases
           + 3 * Np * Cip * 2                      # theta/phi/g scratch (bf16)
           + 6 * tq * Np * 4)                      # f/e/p temporaries + headroom
    vmem_limit = int(min(56 * 2**20, max(16 * 2**20, 2 * est)))

    full = lambda shape: pl.BlockSpec(shape, lambda b, q: (0,) * len(shape))

    wy_pad, nl_pad = pl.pallas_call(
        kernel,
        out_shape=(
            jax.ShapeDtypeStruct((B, Np, Cp), jnp.float32),
            jax.ShapeDtypeStruct((B, Np, Np), jnp.float32),
        ),
        grid_spec=pltpu.PrefetchScalarGridSpec(
            num_scalar_prefetch=0,
            grid=(B, QT),
            in_specs=[
                pl.BlockSpec((1, Np, Cp), lambda b, q: (b, 0, 0)),
                full((Cp, 3 * Cip)), full((1, 3 * Cip)),
                full((Cip, Cp)), full((1, Cp)),
            ],
            out_specs=[
                pl.BlockSpec((1, tq, Cp), lambda b, q: (b, q, 0)),
                pl.BlockSpec((1, tq, Np), lambda b, q: (b, q, 0)),
            ],
            scratch_shapes=[pltpu.VMEM((Np, Cip), jnp.bfloat16)] * 3,
        ),
        compiler_params=pltpu.CompilerParams(
            dimension_semantics=("parallel", "arbitrary"),
            vmem_limit_bytes=vmem_limit),
    )(x_flat, w_all, b_all, ww_p, bw_p)

    # Unpad and restore NCHW.
    w_y = jnp.transpose(wy_pad[:, :N, :Cin], (0, 2, 1)).reshape(B, Cin, H, W)
    nl_map = nl_pad[:, :N, :N]
    return w_y, nl_map


def init_params(key, in_channels, inter_channels):
    """Synthetic parameters matching the module's shapes.

    1x1 Conv2d weights (out, in, 1, 1) are stored transposed as (in, out) so
    they apply as right-hand matmuls in (B, N, C) layout.  BN params follow the
    module's init: weight=0, bias=0, running_mean=0, running_var=1.
    """
    k = jax.random.split(key, 8)
    f32 = jnp.float32

    def conv_w(kk, cin, cout):
        bound = 1.0 / (cin ** 0.5)
        return jax.random.uniform(kk, (cin, cout), f32, -bound, bound)

    return {
        "wg": conv_w(k[0], in_channels, inter_channels),
        "bg": jax.random.uniform(k[1], (inter_channels,), f32, -0.5, 0.5),
        "wt": conv_w(k[2], in_channels, inter_channels),
        "bt": jax.random.uniform(k[3], (inter_channels,), f32, -0.5, 0.5),
        "wp": conv_w(k[4], in_channels, inter_channels),
        "bp": jax.random.uniform(k[5], (inter_channels,), f32, -0.5, 0.5),
        "ww": conv_w(k[6], inter_channels, in_channels),
        "bw": jax.random.uniform(k[7], (in_channels,), f32, -0.5, 0.5),
        "bn_gamma": jnp.zeros((in_channels,), f32),
        "bn_beta": jnp.zeros((in_channels,), f32),
        "bn_mean": jnp.zeros((in_channels,), f32),
        "bn_var": jnp.ones((in_channels,), f32),
    }


def _reference(x_nchw, params, eps=1e-5):
    """Pure-JAX f32 reference mirroring the PyTorch forward (eval-mode BN)."""
    B, Cin, H, W = x_nchw.shape
    N = H * W
    xf = jnp.transpose(x_nchw.reshape(B, Cin, N), (0, 2, 1))          # (B,N,Cin)
    th = xf @ params["wt"] + params["bt"]
    ph = xf @ params["wp"] + params["bp"]
    g = xf @ params["wg"] + params["bg"]
    f = jnp.einsum("bnc,bmc->bnm", th, ph)
    p = jax.nn.softmax(f, axis=-1)
    y = jnp.einsum("bnm,bmc->bnc", p, g)
    wy = y @ params["ww"] + params["bw"]
    scale = params["bn_gamma"] / jnp.sqrt(params["bn_var"] + eps)
    wy = (wy - params["bn_mean"]) * scale + params["bn_beta"]
    w_y = jnp.transpose(wy, (0, 2, 1)).reshape(B, Cin, H, W)
    return w_y, p


if __name__ == "__main__":
    B, Cin, H, W = 2, 4, 16, 16
    Ci = Cin // 2  # inter_channels = in_channels // 2

    key = jax.random.PRNGKey(0)
    kx, kp, kbn = jax.random.split(key, 3)
    x = jax.random.normal(kx, (B, Cin, H, W), jnp.float32)

    # (a) Module-default BN (gamma=beta=0): W_y must be exactly zero.
    params0 = init_params(kp, Cin, Ci)
    w_y0, nl0 = nonlocal_block_2d(x, params0)
    jax.block_until_ready((w_y0, nl0))
    wr0, nr0 = _reference(x, params0)
    assert jnp.allclose(w_y0, wr0, atol=3e-2, rtol=3e-2)
    assert float(jnp.max(jnp.abs(w_y0))) < 1e-6
    assert jnp.allclose(nl0, nr0, atol=3e-2, rtol=3e-2)

    # (b) Non-trivial BN affine / running stats (eval-mode) to actually
    #     exercise the W + BN path numerically (review correctness concern).
    kb = jax.random.split(kbn, 4)
    params1 = dict(params0)
    params1["bn_gamma"] = jax.random.uniform(kb[0], (Cin,), jnp.float32, 0.5, 1.5)
    params1["bn_beta"] = jax.random.uniform(kb[1], (Cin,), jnp.float32, -0.5, 0.5)
    params1["bn_mean"] = jax.random.uniform(kb[2], (Cin,), jnp.float32, -0.5, 0.5)
    params1["bn_var"] = jax.random.uniform(kb[3], (Cin,), jnp.float32, 0.5, 1.5)
    w_y1, nl1 = nonlocal_block_2d(x, params1)
    jax.block_until_ready((w_y1, nl1))
    wr1, nr1 = _reference(x, params1)
    assert jnp.allclose(w_y1, wr1, atol=3e-2, rtol=3e-2)
    assert jnp.allclose(nl1, nr1, atol=3e-2, rtol=3e-2)

    assert w_y1.shape == (B, Cin, H, W)
    assert nl1.shape == (B, H * W, H * W)
    print("KERNEL_OK")
</pallas_src>

<mosaic_0001>
module attributes {stable_mosaic.version = 11 : i64} {
  func.func @kernel(%arg0: i32, %arg1: i32, %arg2: memref<1x256x128xbf16, #tpu.memory_space<vmem>>, %arg3: memref<128x384xbf16, #tpu.memory_space<vmem>>, %arg4: memref<1x384xf32, #tpu.memory_space<vmem>>, %arg5: memref<128x128xbf16, #tpu.memory_space<vmem>>, %arg6: memref<1x128xf32, #tpu.memory_space<vmem>>, %arg7: memref<1x128x128xf32, #tpu.memory_space<vmem>>, %arg8: memref<1x128x256xf32, #tpu.memory_space<vmem>>, %arg9: memref<256x128xbf16, #tpu.memory_space<vmem>>, %arg10: memref<256x128xbf16, #tpu.memory_space<vmem>>, %arg11: memref<256x128xbf16, #tpu.memory_space<vmem>>) attributes {dimension_semantics = [#tpu.dimension_semantics<parallel>, #tpu.dimension_semantics<arbitrary>], iteration_bounds = array<i64: 2, 2>, scalar_prefetch = 0 : i64, scratch_operands = 3 : i64, tpu.core_type = #tpu.core_type<tc>, window_params = [{transform_indices = @transform_0, window_bounds = array<i64: 1, 256, 128>}, {pipeline_mode = #tpu.pipeline_mode<synchronous>, transform_indices = @transform_1, window_bounds = array<i64: 128, 384>}, {pipeline_mode = #tpu.pipeline_mode<synchronous>, transform_indices = @transform_2, window_bounds = array<i64: 1, 384>}, {pipeline_mode = #tpu.pipeline_mode<synchronous>, transform_indices = @transform_3, window_bounds = array<i64: 128, 128>}, {pipeline_mode = #tpu.pipeline_mode<synchronous>, transform_indices = @transform_4, window_bounds = array<i64: 1, 128>}, {transform_indices = @transform_5, window_bounds = array<i64: 1, 128, 128>}, {transform_indices = @transform_6, window_bounds = array<i64: 1, 128, 256>}]} {
    %c0_i32 = arith.constant 0 : i32
    %0 = arith.cmpi eq, %arg1, %c0_i32 : i32
    %1 = arith.extui %0 : i1 to i32
    %c0_i32_0 = arith.constant 0 : i32
    %2 = arith.cmpi ne, %1, %c0_i32_0 : i32
    scf.if %2 {
      %c0_19 = arith.constant 0 : index
      %c0_20 = arith.constant 0 : index
      %c0_21 = arith.constant 0 : index
      %34 = vector.load %arg2[%c0_19, %c0_20, %c0_21] : memref<1x256x128xbf16, #tpu.memory_space<vmem>>, vector<1x256x128xbf16>
      %35 = vector.shape_cast %34 : vector<1x256x128xbf16> to vector<256x128xbf16>
      %c0_22 = arith.constant 0 : index
      %c0_23 = arith.constant 0 : index
      %36 = vector.load %arg3[%c0_22, %c0_23] : memref<128x384xbf16, #tpu.memory_space<vmem>>, vector<128x384xbf16>
      %cst_24 = arith.constant dense<0.000000e+00> : vector<256x384xf32>
      %37 = tpu.matmul %35, %36, %cst_24 {dimension_numbers = #tpu.dot_dimension_numbers<[1], [0], [0], [1], [0, 0, 1, 1], [], []>} : vector<256x128xbf16>, vector<128x384xbf16>, vector<256x384xf32> -> vector<256x384xf32>
      %c0_25 = arith.constant 0 : index
      %c0_26 = arith.constant 0 : index
      %38 = vector.load %arg4[%c0_25, %c0_26] : memref<1x384xf32, #tpu.memory_space<vmem>>, vector<1x384xf32>
      %39 = vector.broadcast %38 : vector<1x384xf32> to vector<256x384xf32>
      %40 = arith.addf %37, %39 : vector<256x384xf32>
      %41 = arith.truncf %40 : vector<256x384xf32> to vector<256x384xbf16>
      %42 = vector.extract_strided_slice %41 {offsets = [0, 0], sizes = [256, 128], strides = [1, 1]} : vector<256x384xbf16> to vector<256x128xbf16>
      %c0_27 = arith.constant 0 : index
      %c0_28 = arith.constant 0 : index
      %43 = vector.load %arg9[%c0_27, %c0_28] : memref<256x128xbf16, #tpu.memory_space<vmem>>, vector<256x128xbf16>
      tpu.vector_store %arg9[%c0_27, %c0_28], %42 {strides = array<i32>} : memref<256x128xbf16, #tpu.memory_space<vmem>>, vector<256x128xbf16>,
      %44 = vector.extract_strided_slice %41 {offsets = [0, 128], sizes = [256, 128], strides = [1, 1]} : vector<256x384xbf16> to vector<256x128xbf16>
      %c0_29 = arith.constant 0 : index
      %c0_30 = arith.constant 0 : index
      %45 = vector.load %arg10[%c0_29, %c0_30] : memref<256x128xbf16, #tpu.memory_space<vmem>>, vector<256x128xbf16>
      tpu.vector_store %arg10[%c0_29, %c0_30], %44 {strides = array<i32>} : memref<256x128xbf16, #tpu.memory_space<vmem>>, vector<256x128xbf16>,
      %46 = vector.extract_strided_slice %41 {offsets = [0, 256], sizes = [256, 128], strides = [1, 1]} : vector<256x384xbf16> to vector<256x128xbf16>
      %c0_31 = arith.constant 0 : index
      %c0_32 = arith.constant 0 : index
      %47 = vector.load %arg11[%c0_31, %c0_32] : memref<256x128xbf16, #tpu.memory_space<vmem>>, vector<256x128xbf16>
      tpu.vector_store %arg11[%c0_31, %c0_32], %46 {strides = array<i32>} : memref<256x128xbf16, #tpu.memory_space<vmem>>, vector<256x128xbf16>,
    } else {
    }
    %c128_i32 = arith.constant 128 : i32
    %3 = arith.muli %arg1, %c128_i32 : i32
    %4 = tpu.assume_multiple %3, 128 : i32
    %5 = arith.index_cast %4 : i32 to index
    %c0 = arith.constant 0 : index
    %6 = vector.load %arg9[%5, %c0] : memref<256x128xbf16, #tpu.memory_space<vmem>>, vector<128x128xbf16>
    %c0_1 = arith.constant 0 : index
    %c0_2 = arith.constant 0 : index
    %7 = vector.load %arg10[%c0_1, %c0_2] : memref<256x128xbf16, #tpu.memory_space<vmem>>, vector<256x128xbf16>
    %cst = arith.constant dense<0.000000e+00> : vector<128x256xf32>
    %8 = tpu.matmul %6, %7, %cst {dimension_numbers = #tpu.dot_dimension_numbers<[1], [1], [0], [0], [0, 0, 1, 0], [], []>} : vector<128x128xbf16>, vector<256x128xbf16>, vector<128x256xf32> -> vector<128x256xf32>
    %cst_3 = arith.constant dense<0xFF800000> : vector<128xf32>
    %9 = vector.multi_reduction <maximumf>, %8, %cst_3 [1] : vector<128x256xf32> to vector<128xf32>
    %10 = vector.shape_cast %9 : vector<128xf32> to vector<128x1xf32>
    %11 = vector.broadcast %10 : vector<128x1xf32> to vector<128x256xf32>
    %12 = arith.subf %8, %11 : vector<128x256xf32>
    %13 = math.exp %12 : vector<128x256xf32>
    %cst_4 = arith.constant dense<0.000000e+00> : vector<128xf32>
    %14 = vector.multi_reduction <add>, %13, %cst_4 [1] : vector<128x256xf32> to vector<128xf32>
    %15 = vector.shape_cast %14 : vector<128xf32> to vector<128x1xf32>
    %16 = tpu.reciprocal %15 {approx = true} : vector<128x1xf32> -> vector<128x1xf32>
    %17 = vector.broadcast %16 : vector<128x1xf32> to vector<128x256xf32>
    %18 = arith.mulf %13, %17 : vector<128x256xf32>
    %19 = arith.truncf %18 : vector<128x256xf32> to vector<128x256xbf16>
    %c0_5 = arith.constant 0 : index
    %c0_6 = arith.constant 0 : index
    %20 = vector.load %arg11[%c0_5, %c0_6] : memref<256x128xbf16, #tpu.memory_space<vmem>>, vector<256x128xbf16>
    %cst_7 = arith.constant dense<0.000000e+00> : vector<128x128xf32>
    %21 = tpu.matmul %19, %20, %cst_7 {dimension_numbers = #tpu.dot_dimension_numbers<[1], [0], [0], [1], [0, 0, 1, 1], [], []>} : vector<128x256xbf16>, vector<256x128xbf16>, vector<128x128xf32> -> vector<128x128xf32>
    %22 = arith.truncf %21 : vector<128x128xf32> to vector<128x128xbf16>
    %c0_8 = arith.constant 0 : index
    %c0_9 = arith.constant 0 : index
    %23 = vector.load %arg5[%c0_8, %c0_9] : memref<128x128xbf16, #tpu.memory_space<vmem>>, vector<128x128xbf16>
    %cst_10 = arith.constant dense<0.000000e+00> : vector<128x128xf32>
    %24 = tpu.matmul %22, %23, %cst_10 {dimension_numbers = #tpu.dot_dimension_numbers<[1], [0], [0], [1], [0, 0, 1, 1], [], []>} : vector<128x128xbf16>, vector<128x128xbf16>, vector<128x128xf32> -> vector<128x128xf32>
    %c0_11 = arith.constant 0 : index
    %c0_12 = arith.constant 0 : index
    %25 = vector.load %arg6[%c0_11, %c0_12] : memref<1x128xf32, #tpu.memory_space<vmem>>, vector<1x128xf32>
    %26 = vector.broadcast %25 : vector<1x128xf32> to vector<128x128xf32>
    %27 = arith.addf %24, %26 : vector<128x128xf32>
    %c0_13 = arith.constant 0 : index
    %c0_14 = arith.constant 0 : index
    %c0_15 = arith.constant 0 : index
    %28 = vector.load %arg7[%c0_13, %c0_14, %c0_15] : memref<1x128x128xf32, #tpu.memory_space<vmem>>, vector<1x128x128xf32>
    %29 = vector.shape_cast %28 : vector<1x128x128xf32> to vector<128x128xf32>
    %30 = vector.shape_cast %27 : vector<128x128xf32> to vector<1x128x128xf32>
    tpu.vector_store %arg7[%c0_13, %c0_14, %c0_15], %30 {strides = array<i32>} : memref<1x128x128xf32, #tpu.memory_space<vmem>>, vector<1x128x128xf32>,
    %c0_16 = arith.constant 0 : index
    %c0_17 = arith.constant 0 : index
    %c0_18 = arith.constant 0 : index
    %31 = vector.load %arg8[%c0_16, %c0_17, %c0_18] : memref<1x128x256xf32, #tpu.memory_space<vmem>>, vector<1x128x256xf32>
    %32 = vector.shape_cast %31 : vector<1x128x256xf32> to vector<128x256xf32>
    %33 = vector.shape_cast %18 : vector<128x256xf32> to vector<1x128x256xf32>
    tpu.vector_store %arg8[%c0_16, %c0_17, %c0_18], %33 {strides = array<i32>} : memref<1x128x256xf32, #tpu.memory_space<vmem>>, vector<1x128x256xf32>,
    return
  }
  func.func @transform_0(%arg0: i32, %arg1: i32) -> (i32, i32, i32) {
    %c0_i32 = arith.constant 0 : i32
    %c0_i32_0 = arith.constant 0 : i32
    %c0_i32_1 = arith.constant 0 : i32
    return %arg0, %c0_i32, %c0_i32_0 : i32, i32, i32
  }
  func.func @transform_1(%arg0: i32, %arg1: i32) -> (i32, i32) {
    %c0_i32 = arith.constant 0 : i32
    %c0_i32_0 = arith.constant 0 : i32
    %c0_i32_1 = arith.constant 0 : i32
    return %c0_i32, %c0_i32_0 : i32, i32
  }
  func.func @transform_2(%arg0: i32, %arg1: i32) -> (i32, i32) {
    %c0_i32 = arith.constant 0 : i32
    %c0_i32_0 = arith.constant 0 : i32
    %c0_i32_1 = arith.constant 0 : i32
    return %c0_i32, %c0_i32_0 : i32, i32
  }
  func.func @transform_3(%arg0: i32, %arg1: i32) -> (i32, i32) {
    %c0_i32 = arith.constant 0 : i32
    %c0_i32_0 = arith.constant 0 : i32
    %c0_i32_1 = arith.constant 0 : i32
    return %c0_i32, %c0_i32_0 : i32, i32
  }
  func.func @transform_4(%arg0: i32, %arg1: i32) -> (i32, i32) {
    %c0_i32 = arith.constant 0 : i32
    %c0_i32_0 = arith.constant 0 : i32
    %c0_i32_1 = arith.constant 0 : i32
    return %c0_i32, %c0_i32_0 : i32, i32
  }
  func.func @transform_5(%arg0: i32, %arg1: i32) -> (i32, i32, i32) {
    %c0_i32 = arith.constant 0 : i32
    %c0_i32_0 = arith.constant 0 : i32
    return %arg0, %arg1, %c0_i32 : i32, i32, i32
  }
  func.func @transform_6(%arg0: i32, %arg1: i32) -> (i32, i32, i32) {
    %c0_i32 = arith.constant 0 : i32
    %c0_i32_0 = arith.constant 0 : i32
    return %arg0, %arg1, %c0_i32 : i32, i32, i32
  }
}

</mosaic_0001>

<bundles_post_ra>
// kernel: tpu_custom_call.1
= control target key start
LH: loop header
LB: loop body
LE: loop exit
PB: predicated region body
PF: predicated region fallthrough
CT: control target
= control target key end

     0   :  { %s3724_s0 = inlined_call_operand.hbm [shape: bf16[2,256,128], index: 0, kind: input, shape index: {}]   ;;  %s3725_s1 = inlined_call_operand.hbm [shape: bf16[128,384], index: 1, kind: input, shape index: {}]   ;;  %s3726_s2 = inlined_call_operand.vmem [shape: f32[1,384], index: 2, kind: input, shape index: {}]   ;;  %s3727_s3 = inlined_call_operand.hbm [shape: bf16[128,128], index: 3, kind: input, shape index: {}]   ;;  %s3728_s4 = inlined_call_operand.vmem [shape: f32[1,128], index: 4, kind: input, shape index: {}]   ;;  %s3729_s5 = inlined_call_operand.hbm [shape: f32[2,256,128], index: 5, kind: output, shape index: {0}]   ;;  %s3730_s6 = inlined_call_operand.hbm [shape: f32[2,256,256], index: 6, kind: output, shape index: {1}]  }
   0x1   :  { %3744 = sst [smem:[#allocation22_spill]] %s3725_s1 }
   0x2   :  { %3745 = sst [smem:[#allocation23_spill]] %s3727_s3 }
   0x3   :  { %3746 = sst [smem:[#allocation24_spill]] %s3728_s4 }
   0x4   :  { %3747 = sst [smem:[#allocation25_spill]] %s3729_s5 }
   0x5   :  { %3748 = sst [smem:[#allocation26_spill]] %s3730_s6 }
   0x6   :  { %12 = vsyncpa [#allocation6], 0 }
   0x7   :  { %14 = vsyncpa [#allocation6 + $0x1], 0 }
   0x8   :  { %15 = vsyncpa [#allocation9], 0 }
   0x9   :  { %16 = vsyncpa [#allocation7], 0 }
   0xa   :  { %18 = vsyncpa [#allocation7 + $0x1], 0 }
   0xb   :  { %19 = vsyncpa [#allocation13], 0 }
   0xc   :  { %21 = vsyncpa [#allocation13 + $0x1], 0  ;;  %s2902_s21 = smov 0   ;;  %s2904_s22 = smov 0  }
   0xd   :  { %s2906_s23 = smov 0   ;;  %s2908_s24 = smov 0  }
   0xe   :  { %s2910_s25 = smov 0   ;;  %s2912_s26 = smov 0  }
   0xf   :  { %s2914_s27 = smov 0   ;;  %s2916_s28 = smov 0  }
  0x10   :  { %s2918_s29 = smov 0   ;;  %s2920_s30 = smov 0  }
  0x11   :  { %s2922_s7 = smov 0  }
  0x12 LB: > { %3749 = sst [smem:[#allocation18_spill]] %s2811_s21  ;;  %s2006_s8 = sadd.s32 4294967295, %s2851_s7   ;;  %s2851_s7 = sphi %s2922_s7, %s27_s7   ;;  %s2847_s30 = sphi %s2920_s30, %s3786_s30   ;;  %s2843_s29 = sphi %s2918_s29, %s3777_s29   ;;  %s2839_s28 = sphi %s2916_s28, %s3785_s28   ;;  %s2835_s27 = sphi %s2914_s27, %s3776_s27   ;;  %s2831_s26 = sphi %s2912_s26, %s3784_s26   ;;  %s2827_s25 = sphi %s2910_s25, %s3783_s25   ;;  %s2823_s24 = sphi %s2908_s24, %s3782_s24   ;;  %s2819_s23 = sphi %s2906_s23, %s3781_s23   ;;  %s2815_s22 = sphi %s2904_s22, %s3780_s22   ;;  %s2811_s21 = sphi %s2902_s21, %s3779_s21  }
  0x13   : > { %3750 = sst [smem:[#allocation19_spill]] %s2843_s29  ;;  %s2007_s9 = sadd.s32 4294967294, %s2851_s7  }
  0x14   : > { %p59_p0 = scmp.ne.s32.totalorder %s2827_s25, %s2823_s24  ;;  %p2958_p1 = scmp.eq.s32.totalorder %s2006_s8, 0 }
  0x15   : > { %p168_p2 = scmp.ne.s32.totalorder %s2819_s23, %s2815_s22  ;;  %p169_p4 = scmp.eq.s32.totalorder %s2006_s8, 3 }
  0x16   : > { %s3751_s10 = scalar_select %p2958_p1, 1, 0 }
  0x17   : > { %p2967_p3 = por %p2958_p1, %p59_p0  ;;  %p174_p5 = scmp.ne.s32.totalorder %s2815_s22, %s2811_s21 }
  0x18   : > { %p175_p6 = scmp.eq.s32.totalorder %s2007_s9, 3  ;;  %p2973_p7 = por %p169_p4, %p168_p2 }
  0x19   : > { %s3752_s12 = scalar_select %p2967_p3, 1, 0 }
  0x1a   : > { %s3753_s13 = scalar_select %p2973_p7, 1, 0 }
  0x1b   : > { %p2008_p8 = scmp.ge.s32.totalorder %s2851_s7, 1  ;;  %p2978_p9 = por %p175_p6, %p174_p5 }
  0x1c   : > { %p210_p10 = scmp.lt.s32.totalorder %s2851_s7, 5  ;;  %s2853_s16 = smov [#allocation8]  }
  0x1d   : > { %s3754_s14 = scalar_select %p2978_p9, 1, 0 }
  0x1e   : > { %p2983_p11 = pnand %p2008_p8, %p210_p10  ;;  %s222_s17 = sshll.u32 %s2853_s16, 4  ;;  %s223_s17 = int_to_ptr.vmem [resolvable:$true] %s222_s17 }
  0x1f   : > { %3755 = sst [smem:[#allocation20_spill]] %s3754_s14  ;;  %s2854_s19 = smov [#allocation10]  }
  0x20   : > { %s3756_s15 = scalar_select %p2983_p11, 1, 0 }
  0x21   : > { %p2332_p12 = pneg %p2983_p11  ;;  %s238_s20 = sshll.u32 %s2854_s19, 4  ;;  %s2995_s20 = int_to_ptr.vmem [resolvable:$true] %s238_s20 }
  0x22   : > { %s3758_s1 = sld [smem:[#allocation22_spill]] }
  0x23   : > { %p2991_p13 = pnand %p2332_p12, %p2958_p1 }
  0x25   : > { %p2609_p2 = pneg %p2991_p13 }
  0x28   : > { %s2607_s9 = scalar_lea.hbm %s3758_s1, 3072 }
  0x29   : > { %p2608_p0 = scmp.ne.s32.totalorder %s3758_s1, %s2607_s9  ;;  %p2614_p6 = scmp.lt.u32.totalorder %s2607_s9, %s3758_s1 }
  0x2b   : > { %p2610_p4 = pnand %p2609_p2, %p2608_p0 }
  0x2d   : > { %p2611_p5 = pneg %p2610_p4 }
  0x2f   : > { %p2616_p8 = pnand %p2614_p6, %p2611_p5 }
  0x31   : > { %2619 = shalt.err (!%p2616_p8)
}
  0x32   : > { %s2620_s19 = scalar_lea.vmem %s223_s17, 3072  ;;  %p2628_p7 = scmp.lt.s32.totalorder %s223_s17, %s223_s17 }
  0x33   : > { %p2621_p10 = scmp.ne.s32.totalorder %s223_s17, %s2620_s19  ;;  %p2629_p1 = scmp.lt.s32.totalorder %s2620_s19, %s2620_s19 }
  0x35   : > { %p2623_p12 = pnand %p2621_p10, %p2609_p2  ;;  %p2630_p3 = por %p2629_p1, %p2628_p7 }
  0x37   : > { %p2624_p9 = pneg %p2623_p12 }
  0x39   : > { %p2631_p11 = pnand %p2630_p3, %p2624_p9 }
  0x3b   : > { %2634 = shalt.err (!%p2631_p11)
}
  0x3c   : > { %s2855_s11 = smov 192   ;;  %s2856_s24 = smov 12  }
  0x3d   : > { %2335 = dma.hbm_to_vmem [thread:$0]  (!%p2991_p13), %s3758_s1, 3072, %s223_s17, [#allocation9], %s2855_s11, %s2855_s11, %s2856_s24  }
  0x3e   : > { %s3759_s3 = sld [smem:[#allocation23_spill]] }
  0x44   : > { %s2635_s16 = scalar_lea.hbm %s3759_s3, 1024 }
  0x45   : > { %p2636_p0 = scmp.ne.s32.totalorder %s3759_s3, %s2635_s16  ;;  %p2642_p7 = scmp.lt.u32.totalorder %s2635_s16, %s3759_s3 }
  0x47   : > { %p2638_p1 = pnand %p2636_p0, %p2609_p2 }
  0x49   : > { %p2639_p3 = pneg %p2638_p1 }
  0x4b   : > { %p2644_p9 = pnand %p2642_p7, %p2639_p3 }
  0x4d   : > { %2647 = shalt.err (!%p2644_p9)
}
  0x4e   : > { %s2648_s17 = scalar_lea.vmem %s2995_s20, 1024  ;;  %p2656_p6 = scmp.lt.s32.totalorder %s2995_s20, %s2995_s20 }
  0x4f   : > { %p2649_p11 = scmp.ne.s32.totalorder %s2995_s20, %s2648_s17  ;;  %p2657_p8 = scmp.lt.s32.totalorder %s2648_s17, %s2648_s17 }
  0x51   : > { %p2651_p4 = pnand %p2649_p11, %p2609_p2  ;;  %p2658_p10 = por %p2657_p8, %p2656_p6 }
  0x53   : > { %p2652_p5 = pneg %p2651_p4 }
  0x55   : > { %p2659_p12 = pnand %p2658_p10, %p2652_p5 }
  0x57   : > { %2662 = shalt.err (!%p2659_p12)
}
  0x58   : > { %s3740_s4 = smov 64   ;;  %s3741_s5 = smov 4  }
  0x59   : > { %2338 = dma.hbm_to_vmem [thread:$0]  (!%p2991_p13), %s3759_s3, 1024, %s2995_s20, [#allocation9], %s3740_s4, %s3740_s4, %s3741_s5  }
  0x5a   : > { %s36_s24 = sadd.s32 1, %s2843_s29  ;;  %s39_s21 = sadd.s32 1, %s2847_s30 }
  0x5b   : > { %p37_p2 = scmp.ge.s32.totalorder %s36_s24, 2  ;;  %s46_s14 = sadd.s32 1, %s2831_s26 }
  0x5c   : > { %p53_p0 = scmp.ne.s32.totalorder %s2831_s26, %s2827_s25  ;;  %p54_p1 = scmp.eq.s32.totalorder %s2851_s7, 0 }
  0x5d   : > { %s3788_s24 = smov (%p37_p2, %s36_s24), 0  ;;  %s3790_s21 = smov (!%p37_p2, %s39_s21), %s2847_s30 }
  0x5e   : > { %3760 = sst [smem:[#allocation21_spill]] %s3788_s24  ;;  %p3056_p3 = por %p54_p1, %p53_p0 }
  0x5f   : > { %s154_s8 = ssub.s32 %s2843_s29, %s3788_s24  ;;  %p41_p13 = scmp.ge.s32.totalorder %s3790_s21, 2 }
  0x60   : > { %p2352_p7 = scmp.lt.s32.totalorder %s2851_s7, 4  ;;  %s255_s20 = sand.u32 1, %s2831_s26  }
  0x61   : > { %s2084_s9 = sshll.u32 %s2847_s30, 11  ;;  %s3792_s21 = smov (%p41_p13, %s3790_s21), 0 }
  0x62   : > { %s2012_s16 = sshll.u32 %s255_s20, 7  ;;  %s43_s19 = ssub.s32 %s2847_s30, %s3792_s21 }
  0x63   : > { %p44_p9 = scmp.eq.s32.totalorder %s43_s19, 0  ;;  %s155_s17 = sor.u32 %s154_s8, %s43_s19 }
  0x64   : > { %p156_p11 = scmp.eq.s32.totalorder %s155_s17, 0  ;;  %s3072_s4 = scalar_lea.hbm %s3724_s0, %s2084_s9 }
  0x65   : > { %s3075_s5 = scalar_select %p44_p9, %s2831_s26, %s46_s14  }
  0x66   : > { %s3762_s1 = sadd.s32 1, %s2819_s23  ;;  %s259_s24 = scalar_lea.vmem [#allocation5], %s2012_s16 }
  0x67   : > { %s3080_s3 = scalar_select %p156_p11, %s2819_s23, %s3762_s1  }
  0x68   : > { %s266_s29 = sshll.u32 %s259_s24, 4  ;;  %p3086_p4 = pnand %p2352_p7, %p3056_p3  ;;  %s3090_s29 = int_to_ptr.vmem [resolvable:$true] %s266_s29 }
  0x69   : > { %s3092_s9 = scalar_lea.sflag [#allocation6], %s255_s20  ;;  %s2663_s14 = scalar_lea.hbm %s3072_s4, 2048 }
  0x6a   : > { %p2664_p5 = scmp.ne.s32.totalorder %s3072_s4, %s2663_s14  ;;  %p2665_p6 = pneg %p3086_p4 }
  0x6b   : > { %s2668_s18 = scalar_lea.hbm %s3724_s0, 4096  ;;  %p2669_p12 = scmp.lt.u32.totalorder %s3072_s4, %s3724_s0 }
  0x6c   : > { %p2666_p8 = pnand %p2665_p6, %p2664_p5  ;;  %p2670_p2 = scmp.lt.u32.totalorder %s2668_s18, %s2663_s14 }
  0x6d   : > { %p2672_p1 = scmp.lt.u32.totalorder %s2663_s14, %s3072_s4 }
  0x6e   : > { %p2667_p10 = pneg %p2666_p8  ;;  %p2671_p0 = por %p2670_p2, %p2669_p12 }
  0x70   : > { %p2673_p3 = por %p2672_p1, %p2671_p0 }
  0x72   : > { %p2674_p13 = pnand %p2673_p3, %p2667_p10 }
  0x74   : > { %2677 = shalt.err (!%p2674_p13)
}
  0x75   : > { %s2678_s20 = scalar_lea.vmem %s3090_s29, 2048  ;;  %s2859_s17 = smov [#allocation5]  }
  0x76   : > { %p2679_p7 = scmp.ne.s32.totalorder %s3090_s29, %s2678_s20  ;;  %s2683_s6 = sshll.u32 %s2859_s17, 4  ;;  %s2684_s6 = int_to_ptr.vmem [resolvable:$false] %s2683_s6 }
  0x77   : > { %s2685_s11 = scalar_lea.vmem %s2684_s6, 4096  ;;  %p2686_p5 = scmp.lt.s32.totalorder %s3090_s29, %s2684_s6 }
  0x78   : > { %p2681_p9 = pnand %p2679_p7, %p2665_p6  ;;  %p2687_p8 = scmp.lt.s32.totalorder %s2685_s11, %s2678_s20 }
  0x7a   : > { %p2682_p11 = pneg %p2681_p9  ;;  %p2688_p12 = por %p2687_p8, %p2686_p5 }
  0x7c   : > { %p2689_p2 = pnand %p2688_p12, %p2682_p11 }
  0x7e   : > { %2692 = shalt.err (!%p2689_p2)
}
  0x7f   : > { %s3764_s14 = smov 4   ;;  %s3765_s1 = smov 64  }
  0x80   : > { %2342 = dma.hbm_to_vmem [thread:$0]  (!%p3086_p4), %s3072_s4, 2048, %s3090_s29, %s3092_s9, %s3765_s1, %s3765_s1, %s3764_s14  }
  0x81   : > { %p3766_p6 = scmp.ne.s32.totalorder %s3756_s15, 0 }
  0x82   : > { %s280_s24 = sand.u32 (!%p3766_p6), 1, %s2827_s25   ;;  %p3767_p10 = scmp.ne.s32.totalorder (!%p3766_p6), %s3752_s12, 0 }
  0x83   : > { %278 = sbr.rel (%p3766_p6) target bundleno = 1594 (0x63a), region = 40  ;;  %s2016_s18 = sshll.u32 (!%p3766_p6), %s280_s24, 7 }
  0x84   : > { %s281_s16 = scalar_lea.sflag (!%p3766_p6), [#allocation6], %s280_s24  ;;  %s3126_s19 = scalar_lea.vmem (!%p3766_p6), [#allocation5], %s2016_s18 }
  0x8a   : > { %2794 = dma.done.wait (%p3767_p10), %s281_s16, 2048  }
  0x8b   : > { %2796 = vsyncadd (%p3767_p10), %s281_s16, 4294965248  ;;  %p3768_p0 = scmp.ne.s32.totalorder %s3751_s10, 0 }
  0x8d   : > { %2798 = dma.done.wait (%p3768_p0), [#allocation9], 4096  }
  0x8e   : > { %2800 = vsyncadd (%p3768_p0), [#allocation9], 4294963200  ;;  %s3137_s29 = sand.u32 1, %s2815_s22   ;;  %p2021_p4 = scmp.ne.s32.totalorder %s2835_s27, 0 }
  0x8f   : > { %s2019_s15 = sshll.u32 %s3137_s29, 7  ;;  %s2020_s4 = sshll.u32 %s3137_s29, 8  ;;  %v2455_v0 = vld [vmem:[#allocation8 + $0x4] ss:$12 sps:$4 sm:$0xff] (!%p2021_p4)   ;;  %v2457_v1 = vld [vmem:[#allocation8] ss:$12 sps:$4 sm:$0xff] (!%p2021_p4)   ;;  %v399_v41 = vlaneseq (!%p2021_p4) }
  0x90   : > { %s3141_s8 = scalar_lea.vmem [#allocation11], %s2019_s15  ;;  %s3143_s9 = scalar_lea.vmem [#allocation12], %s2020_s4  ;;  %v2860_v2 = vmov (!%p2021_p4), 0   ;;  %638 = vmatprep.subr.bf16.mxu0 (!%p2021_p4), %v2455_v0  ;;  %2302 = vmatprep.subr.bf16.mxu1 (!%p2021_p4), %v2455_v0  ;;  %v2458_v3 = vld [vmem:[#allocation8 + $0x1c] ss:$12 sps:$4 sm:$0xff] (!%p2021_p4)   ;;  %v2479_v18 = vld [vmem:[%s3126_s19] sm:$0xff] (!%p2021_p4)  }
  0x91   : > { %332 = sbr.rel (%p2021_p4) target bundleno = 485 (0x1e5), region = 56  ;;  %670 = vmatprep.mubr.bf16.mxu0 (!%p2021_p4), %v2860_v2  ;;  %790 = vmatprep.mubr.bf16.mxu1 (!%p2021_p4), %v2860_v2  ;;  %v2460_v4 = vld [vmem:[#allocation8 + $0x18] ss:$12 sps:$4 sm:$0xff] (!%p2021_p4)   ;;  %v2461_v5 = vld [vmem:[#allocation8 + $0x34] ss:$12 sps:$4 sm:$0xff] (!%p2021_p4)   ;;  %v2483_v22 = vld [vmem:[%s3126_s19 + $0x8] sm:$0xff] (!%p2021_p4)  }
  0x92   : > { %639 = vmatpush1.bf16.msra.mxu0 (!%p2021_p4), %v2457_v1  ;;  %2310 = vmatpush1.bf16.msra.mxu1 (!%p2021_p4), %v2457_v1  ;;  %v2463_v6 = vld [vmem:[#allocation8 + $0x30] ss:$12 sps:$4 sm:$0xff] (!%p2021_p4)   ;;  %v2464_v7 = vld [vmem:[#allocation8 + $0x4c] ss:$12 sps:$4 sm:$0xff] (!%p2021_p4)   ;;  %v2466_v8 = vld [vmem:[#allocation8 + $0x48] ss:$12 sps:$4 sm:$0xff] (!%p2021_p4)  }
  0x93   : > { %640 = vmatprep.subr.bf16.mxu0 (!%p2021_p4), %v2458_v3  ;;  %2303 = vmatprep.subr.bf16.mxu1 (!%p2021_p4), %v2458_v3  ;;  %v2467_v9 = vld [vmem:[#allocation8 + $0x64] ss:$12 sps:$4 sm:$0xff] (!%p2021_p4)   ;;  %v2469_v10 = vld [vmem:[#allocation8 + $0x60] ss:$12 sps:$4 sm:$0xff] (!%p2021_p4)   ;;  %v2470_v11 = vld [vmem:[#allocation8 + $0x7c] ss:$12 sps:$4 sm:$0xff] (!%p2021_p4)  }
  0x94   : > { %v2472_v12 = vld [vmem:[#allocation8 + $0x78] ss:$12 sps:$4 sm:$0xff] (!%p2021_p4)   ;;  %v2473_v13 = vld [vmem:[#allocation8 + $0x94] ss:$12 sps:$4 sm:$0xff] (!%p2021_p4)   ;;  %v2475_v14 = vld [vmem:[#allocation8 + $0x90] ss:$12 sps:$4 sm:$0xff] (!%p2021_p4)  }
  0x95   : > { %v2476_v15 = vld [vmem:[#allocation8 + $0xac] ss:$12 sps:$4 sm:$0xff] (!%p2021_p4)   ;;  %v2478_v16 = vld [vmem:[#allocation8 + $0xa8] ss:$12 sps:$4 sm:$0xff] (!%p2021_p4)   ;;  %v3150_v19 = vld [vmem:[%s3126_s19 + $0x60] sm:$0xff] (!%p2021_p4)   ;;  %v3186_v42 = vshrl.u32 (!%p2021_p4), %v399_v41, 7 }
  0x96   : > { %641 = vmatpush1.bf16.msra.mxu0 (!%p2021_p4), %v2460_v4  ;;  %2311 = vmatpush1.bf16.msra.mxu1 (!%p2021_p4), %v2460_v4  ;;  %v2481_v17 = vld [vmem:[#allocation8 + $0x8] ss:$12 sps:$4 sm:$0xff] (!%p2021_p4)   ;;  %v2482_v20 = vld [vmem:[#allocation8 + $0x20] ss:$12 sps:$4 sm:$0xff] (!%p2021_p4)   ;;  %v2485_v21 = vld [vmem:[#allocation8 + $0x38] ss:$12 sps:$4 sm:$0xff] (!%p2021_p4)  }
  0x97   : > { %642 = vmatprep.subr.bf16.mxu0 (!%p2021_p4), %v2461_v5  ;;  %2304 = vmatprep.subr.bf16.mxu1 (!%p2021_p4), %v2461_v5  ;;  %v3157_v23 = vld [vmem:[%s3126_s19 + $0x68] sm:$0xff] (!%p2021_p4)   ;;  %v2486_v24 = vld [vmem:[#allocation8 + $0x50] ss:$12 sps:$4 sm:$0xff] (!%p2021_p4)   ;;  %v2493_v29 = vld [vmem:[#allocation8 + $0x98] ss:$12 sps:$4 sm:$0xff] (!%p2021_p4)   ;;  %v401_v43 = vsub.s32 (!%p2021_p4), 0, %v3186_v42 }
  0x98   : > { %v2489_v25 = vld [vmem:[#allocation8 + $0x68] ss:$12 sps:$4 sm:$0xff]   ;;  %v2490_v28 = vld [vmem:[#allocation8 + $0x80] ss:$12 sps:$4 sm:$0xff]   ;;  %v2491_v30 = vld [vmem:[%s3126_s19 + $0x18] sm:$0xff]   ;;  %v405_v45 = vsub.s32 1, %v3186_v42 }
  0x99   : > { %v2487_v26 = vld [vmem:[%s3126_s19 + $0x10] sm:$0xff]   ;;  %v2492_v31 = vld [vmem:[%s3126_s19 + $0x78] sm:$0xff]   ;;  %v2495_v33 = vld [vmem:[%s3126_s19 + $0x20] sm:$0xff]  }
  0x9a   : > { %643 = vmatpush1.bf16.msra.mxu0 %v2463_v6  ;;  %2312 = vmatpush1.bf16.msra.mxu1 %v2463_v6  ;;  %v2488_v27 = vld [vmem:[%s3126_s19 + $0x70] sm:$0xff]   ;;  %v2496_v34 = vld [vmem:[%s3126_s19 + $0x28] sm:$0xff]   ;;  %v2498_v36 = vld [vmem:[%s3126_s19 + $0x38] sm:$0xff]  }
  0x9b   : > { %644 = vmatprep.subr.bf16.mxu0 %v2464_v7  ;;  %2305 = vmatprep.subr.bf16.mxu1 %v2464_v7  ;;  %v2494_v32 = vld [vmem:[#allocation8 + $0xb0] ss:$12 sps:$4 sm:$0xff]   ;;  %v2499_v37 = vld [vmem:[%s3126_s19 + $0x40] sm:$0xff]   ;;  %v2500_v38 = vld [vmem:[%s3126_s19 + $0x48] sm:$0xff]  }
  0x9c   : > { %v2497_v35 = vld [vmem:[%s3126_s19 + $0x30] sm:$0xff]   ;;  %v2502_v40 = vld [vmem:[%s3126_s19 + $0x58] sm:$0xff]   ;;  %v3192_v44 = vld [vmem:[%s3726_s2] sm:$0x7] }
  0x9d   : > { %v2501_v39 = vld [vmem:[%s3126_s19 + $0x50] sm:$0xff]   ;;  %v3196_v46 = vrot.slane %v3192_v44, %v401_v43  ;;  %v3199_v49 = vrot.slane %v3192_v44, %v405_v45 }
  0x9e   : > { %645 = vmatpush1.bf16.msra.mxu0 %v2466_v8  ;;  %2313 = vmatpush1.bf16.msra.mxu1 %v2466_v8 }
  0x9f   : > { %646 = vmatprep.subr.bf16.mxu0 %v2467_v9  ;;  %2306 = vmatprep.subr.bf16.mxu1 %v2467_v9 }
  0xa2   : > { %647 = vmatpush1.bf16.msra.mxu0 %v2469_v10  ;;  %2314 = vmatpush1.bf16.msra.mxu1 %v2469_v10 }
  0xa3   : > { %648 = vmatprep.subr.bf16.mxu0 %v2470_v11  ;;  %2307 = vmatprep.subr.bf16.mxu1 %v2470_v11 }
  0xa6   : > { %649 = vmatpush1.bf16.msra.mxu0 %v2472_v12  ;;  %2315 = vmatpush1.bf16.msra.mxu1 %v2472_v12 }
  0xa7   : > { %650 = vmatprep.subr.bf16.mxu0 %v2473_v13  ;;  %2308 = vmatprep.subr.bf16.mxu1 %v2473_v13 }
  0xaa   : > { %651 = vmatpush1.bf16.msra.mxu0 %v2475_v14  ;;  %2316 = vmatpush1.bf16.msra.mxu1 %v2475_v14 }
  0xab   : > { %652 = vmatprep.subr.bf16.mxu0 %v2476_v15  ;;  %2309 = vmatprep.subr.bf16.mxu1 %v2476_v15 }
  0xae   : > { %653 = vmatpush1.bf16.msra.mxu0 %v2478_v16  ;;  %2317 = vmatpush1.bf16.msra.mxu1 %v2478_v16 }
  0xaf   : > { %2222 = vmatprep.subr.bf16.mxu1 %v2481_v17 }
  0xb1   : > { %671 = vmatmul.mubr.bf16.vlgmr.msra.gmra.mrb[0].mxu0 %v2479_v18  ;;  %791 = vmatmul.mubr.bf16.vlgmr.msra.gmra.mrb[0].mxu1 %v3150_v19 }
  0xb2   : > { %2223 = vmatpush3.bf16.msra.mxu1 %v2481_v17  ;;  %680 = vmatprep.mubr.bf16.mxu0 %v2860_v2 }
  0xb3   : > { %2224 = vmatprep.subr.bf16.mxu1 %v2482_v20  ;;  %800 = vmatprep.mubr.bf16.mxu1 %v2860_v2 }
  0xb6   : > { %2225 = vmatpush3.bf16.msra.mxu1 %v2482_v20 }
  0xb7   : > { %2226 = vmatprep.subr.bf16.mxu1 %v2485_v21 }
  0xb9   : > { %681 = vmatmul.mubr.bf16.gmra.mrb[4].mxu0 %v2483_v22  ;;  %801 = vmatmul.mubr.bf16.gmra.mrb[4].mxu1 %v3157_v23 }
  0xba   : > { %2227 = vmatpush3.bf16.msra.mxu1 %v2485_v21  ;;  %690 = vmatprep.mubr.bf16.mxu0 %v2860_v2 }
  0xbb   : > { %2228 = vmatprep.subr.bf16.mxu1 %v2486_v24  ;;  %810 = vmatprep.mubr.bf16.mxu1 %v2860_v2 }
  0xbe   : > { %2229 = vmatpush3.bf16.msra.mxu1 %v2486_v24 }
  0xbf   : > { %2230 = vmatprep.subr.bf16.mxu1 %v2489_v25 }
  0xc1   : > { %691 = vmatmul.mubr.bf16.gmra.mrb[8].mxu0 %v2487_v26  ;;  %811 = vmatmul.mubr.bf16.gmra.mrb[8].mxu1 %v2488_v27 }
  0xc2   : > { %2231 = vmatpush3.bf16.msra.mxu1 %v2489_v25  ;;  %700 = vmatprep.mubr.bf16.mxu0 %v2860_v2 }
  0xc3   : > { %2232 = vmatprep.subr.bf16.mxu1 %v2490_v28  ;;  %820 = vmatprep.mubr.bf16.mxu1 %v2860_v2 }
  0xc6   : > { %2233 = vmatpush3.bf16.msra.mxu1 %v2490_v28 }
  0xc7   : > { %2234 = vmatprep.subr.bf16.mxu1 %v2493_v29 }
  0xc9   : > { %701 = vmatmul.mubr.bf16.gmra.mrb[12].mxu0 %v2491_v30  ;;  %821 = vmatmul.mubr.bf16.gmra.mrb[12].mxu1 %v2492_v31 }
  0xca   : > { %2235 = vmatpush3.bf16.msra.mxu1 %v2493_v29  ;;  %710 = vmatprep.mubr.bf16.mxu0 %v2860_v2 }
  0xcb   : > { %2236 = vmatprep.subr.bf16.mxu1 %v2494_v32  ;;  %2238 = vmatprep.mubr.bf16.mxu1 %v2479_v18 }
  0xce   : > { %2237 = vmatpush3.bf16.msra.mxu1 %v2494_v32 }
  0xd1   : > { %711 = vmatmul.mubr.bf16.gmra.mrb[16].mxu0 %v2495_v33  ;;  %2239 = vmatmul.mubr.bf16.vlgmr.msra.gmra.mrb[16].mxu1 %v2483_v22 }
  0xd2   : > { %720 = vmatprep.mubr.bf16.mxu0 %v2860_v2  ;;  %2242 = vmatprep.mubr.bf16.mxu1 %v2487_v26 }
  0xd9   : > { %721 = vmatmul.mubr.bf16.gmra.mrb[20].mxu0 %v2496_v34  ;;  %2243 = vmatmul.mubr.bf16.gmra.mrb[20].mxu1 %v2491_v30 }
  0xda   : > { %730 = vmatprep.mubr.bf16.mxu0 %v2860_v2  ;;  %2246 = vmatprep.mubr.bf16.mxu1 %v2495_v33 }
  0xe1   : > { %731 = vmatmul.mubr.bf16.gmra.mrb[24].mxu0 %v2497_v35  ;;  %2247 = vmatmul.mubr.bf16.gmra.mrb[24].mxu1 %v2496_v34 }
  0xe2   : > { %740 = vmatprep.mubr.bf16.mxu0 %v2860_v2  ;;  %2250 = vmatprep.mubr.bf16.mxu1 %v2497_v35 }
  0xe9   : > { %741 = vmatmul.mubr.bf16.gmra.mrb[28].mxu0 %v2498_v36  ;;  %2251 = vmatmul.mubr.bf16.gmra.mrb[28].mxu1 %v2498_v36 }
  0xea   : > { %750 = vmatprep.mubr.bf16.mxu0 %v2860_v2  ;;  %2254 = vmatprep.mubr.bf16.mxu1 %v2499_v37 }
  0xf1   : > { %751 = vmatmul.mubr.bf16.gmra.mrb[32].mxu0 %v2499_v37  ;;  %2255 = vmatmul.mubr.bf16.gmra.mrb[32].mxu1 %v2500_v38 }
  0xf2   : > { %760 = vmatprep.mubr.bf16.mxu0 %v2860_v2  ;;  %2258 = vmatprep.mubr.bf16.mxu1 %v2501_v39 }
  0xf9   : > { %761 = vmatmul.mubr.bf16.gmra.mrb[36].mxu0 %v2500_v38  ;;  %2259 = vmatmul.mubr.bf16.gmra.mrb[36].mxu1 %v2502_v40 }
  0xfa   : > { %770 = vmatprep.mubr.bf16.mxu0 %v2860_v2  ;;  %2262 = vmatprep.mubr.bf16.mxu1 %v3150_v19 }
 0x101   : > { %771 = vmatmul.mubr.bf16.gmra.mrb[40].mxu0 %v2501_v39  ;;  %2263 = vmatmul.mubr.bf16.gmra.mrb[40].mxu1 %v3157_v23 }
 0x102   : > { %780 = vmatprep.mubr.bf16.mxu0 %v2860_v2  ;;  %2266 = vmatprep.mubr.bf16.mxu1 %v2488_v27 }
 0x109   : > { %781 = vmatmul.mubr.bf16.gmra.mrb[44].mxu0 %v2502_v40  ;;  %2267 = vmatmul.mubr.bf16.gmra.mrb[44].mxu1 %v2492_v31 }
 0x184   : > { %v672_v47 = vpop.f32.mrb[0].mxu0  ;;  %v792_v48 = vpop.f32.mrb[0].mxu1 }
 0x185   : > { %v674_v50 = vpop.f32.mrb[1].mxu0  ;;  %v794_v51 = vpop.f32.mrb[1].mxu1  ;;  %v673_v54 = vadd.f32 %v672_v47, %v3196_v46  ;;  %v793_v55 = vadd.f32 %v792_v48, %v3196_v46 }
 0x186   : > { %v676_v52 = vpop.f32.mrb[2].mxu0  ;;  %v796_v53 = vpop.f32.mrb[2].mxu1  ;;  %v675_v60 = vadd.f32 %v674_v50, %v3199_v49  ;;  %v795_v61 = vadd.f32 %v794_v51, %v3199_v49 }
 0x187   : > { %v677_v56 = vadd.f32 %v676_v52, %v3196_v46  ;;  %v797_v57 = vadd.f32 %v796_v53, %v3196_v46  ;;  %v678_v58 = vpop.f32.mrb[3].mxu0  ;;  %v798_v59 = vpop.f32.mrb[3].mxu1 }
 0x188   : > { %v679_v62 = vadd.f32 %v678_v58, %v3199_v49  ;;  %v799_v63 = vadd.f32 %v798_v59, %v3199_v49 }
 0x189   : > { %v992_v0 = vpack.c.bf16 %v677_v56, %v673_v54  ;;  %v1028_v1 = vpack.c.bf16 %v797_v57, %v793_v55  ;;  %v409_v54 = vsub.s32 2, %v3186_v42 }
 0x18a   : > { %v993_v2 = vpack.c.bf16 %v679_v62, %v675_v60  ;;  %v1029_v3 = vpack.c.bf16 %v799_v63, %v795_v61 }
 0x18b   : > { %1040 = vst [vmem:[#allocation2] sm:$0xff] %v992_v0  ;;  %1052 = vst [vmem:[#allocation2 + $0x60] sm:$0xff] %v1028_v1 }
 0x18c   : > { %1056 = vst [vmem:[#allocation3] sm:$0xff] %v993_v2  ;;  %1068 = vst [vmem:[#allocation3 + $0x60] sm:$0xff] %v1029_v3  ;;  %v682_v4 = vpop.f32.mrb[4].mxu0  ;;  %v802_v5 = vpop.f32.mrb[4].mxu1 }
 0x18d   : > { %v684_v6 = vpop.f32.mrb[5].mxu0  ;;  %v804_v7 = vpop.f32.mrb[5].mxu1  ;;  %v683_v10 = vadd.f32 %v682_v4, %v3196_v46  ;;  %v803_v11 = vadd.f32 %v802_v5, %v3196_v46  ;;  %v3235_v4 = vrot.slane %v3192_v44, %v409_v54 }
 0x18e   : > { %v686_v8 = vpop.f32.mrb[6].mxu0  ;;  %v806_v9 = vpop.f32.mrb[6].mxu1  ;;  %v685_v16 = vadd.f32 %v684_v6, %v3199_v49  ;;  %v805_v17 = vadd.f32 %v804_v7, %v3199_v49 }
 0x18f   : > { %v687_v12 = vadd.f32 %v686_v8, %v3196_v46  ;;  %v807_v13 = vadd.f32 %v806_v9, %v3196_v46  ;;  %v688_v14 = vpop.f32.mrb[7].mxu0  ;;  %v808_v15 = vpop.f32.mrb[7].mxu1 }
 0x190   : > { %v689_v18 = vadd.f32 %v688_v14, %v3199_v49  ;;  %v809_v19 = vadd.f32 %v808_v15, %v3199_v49 }
 0x191   : > { %v995_v20 = vpack.c.bf16 %v687_v12, %v683_v10  ;;  %v1031_v21 = vpack.c.bf16 %v807_v13, %v803_v11 }
 0x192   : > { %v996_v22 = vpack.c.bf16 %v689_v18, %v685_v16  ;;  %v1032_v23 = vpack.c.bf16 %v809_v19, %v805_v17 }
 0x193   : > { %1041 = vst [vmem:[#allocation2 + $0x8] sm:$0xff] %v995_v20  ;;  %1053 = vst [vmem:[#allocation2 + $0x68] sm:$0xff] %v1031_v21 }
 0x194   : > { %1057 = vst [vmem:[#allocation3 + $0x8] sm:$0xff] %v996_v22  ;;  %1069 = vst [vmem:[#allocation3 + $0x68] sm:$0xff] %v1032_v23  ;;  %v692_v24 = vpop.f32.mrb[8].mxu0  ;;  %v812_v25 = vpop.f32.mrb[8].mxu1 }
 0x195   : > { %v694_v26 = vpop.f32.mrb[9].mxu0  ;;  %v814_v27 = vpop.f32.mrb[9].mxu1  ;;  %v693_v30 = vadd.f32 %v692_v24, %v3196_v46  ;;  %v813_v31 = vadd.f32 %v812_v25, %v3196_v46 }
 0x196   : > { %v696_v28 = vpop.f32.mrb[10].mxu0  ;;  %v816_v29 = vpop.f32.mrb[10].mxu1  ;;  %v695_v36 = vadd.f32 %v694_v26, %v3199_v49  ;;  %v815_v37 = vadd.f32 %v814_v27, %v3199_v49 }
 0x197   : > { %v697_v32 = vadd.f32 %v696_v28, %v3196_v46  ;;  %v817_v33 = vadd.f32 %v816_v29, %v3196_v46  ;;  %v698_v34 = vpop.f32.mrb[11].mxu0  ;;  %v818_v35 = vpop.f32.mrb[11].mxu1 }
 0x198   : > { %v699_v38 = vadd.f32 %v698_v34, %v3199_v49  ;;  %v819_v39 = vadd.f32 %v818_v35, %v3199_v49 }
 0x199   : > { %v998_v40 = vpack.c.bf16 %v697_v32, %v693_v30  ;;  %v1034_v41 = vpack.c.bf16 %v817_v33, %v813_v31 }
 0x19a   : > { %v999_v43 = vpack.c.bf16 %v699_v38, %v695_v36  ;;  %v1035_v45 = vpack.c.bf16 %v819_v39, %v815_v37 }
 0x19b   : > { %1042 = vst [vmem:[#allocation2 + $0x10] sm:$0xff] %v998_v40  ;;  %1054 = vst [vmem:[#allocation2 + $0x70] sm:$0xff] %v1034_v41 }
 0x19c   : > { %1058 = vst [vmem:[#allocation3 + $0x10] sm:$0xff] %v999_v43  ;;  %1070 = vst [vmem:[#allocation3 + $0x70] sm:$0xff] %v1035_v45  ;;  %v702_v47 = vpop.f32.mrb[12].mxu0  ;;  %v822_v48 = vpop.f32.mrb[12].mxu1 }
 0x19d   : > { %v704_v50 = vpop.f32.mrb[13].mxu0  ;;  %v824_v51 = vpop.f32.mrb[13].mxu1  ;;  %v703_v55 = vadd.f32 %v702_v47, %v3196_v46  ;;  %v823_v56 = vadd.f32 %v822_v48, %v3196_v46 }
 0x19e   : > { %v706_v52 = vpop.f32.mrb[14].mxu0  ;;  %v826_v53 = vpop.f32.mrb[14].mxu1  ;;  %v705_v61 = vadd.f32 %v704_v50, %v3199_v49  ;;  %v825_v62 = vadd.f32 %v824_v51, %v3199_v49 }
 0x19f   : > { %v707_v57 = vadd.f32 %v706_v52, %v3196_v46  ;;  %v827_v58 = vadd.f32 %v826_v53, %v3196_v46  ;;  %v708_v59 = vpop.f32.mrb[15].mxu0  ;;  %v828_v60 = vpop.f32.mrb[15].mxu1 }
 0x1a0   : > { %v709_v63 = vadd.f32 %v708_v59, %v3199_v49  ;;  %v829_v0 = vadd.f32 %v828_v60, %v3199_v49 }
 0x1a1   : > { %v1001_v1 = vpack.c.bf16 %v707_v57, %v703_v55  ;;  %v1037_v42 = vpack.c.bf16 %v827_v58, %v823_v56 }
 0x1a2   : > { %v1002_v2 = vpack.c.bf16 %v709_v63, %v705_v61  ;;  %v1038_v3 = vpack.c.bf16 %v829_v0, %v825_v62 }
 0x1a3   : > { %1043 = vst [vmem:[#allocation2 + $0x18] sm:$0xff] %v1001_v1  ;;  %1055 = vst [vmem:[#allocation2 + $0x78] sm:$0xff] %v1037_v42 }
 0x1a4   : > { %1059 = vst [vmem:[#allocation3 + $0x18] sm:$0xff] %v1002_v2  ;;  %1071 = vst [vmem:[#allocation3 + $0x78] sm:$0xff] %v1038_v3  ;;  %v712_v5 = vpop.f32.mrb[16].mxu0  ;;  %v2240_v6 = vpop.f32.mrb[16].mxu1 }
 0x1a5   : > { %v714_v7 = vpop.f32.mrb[17].mxu0  ;;  %v865_v8 = vpop.f32.mrb[17].mxu1  ;;  %v713_v11 = vadd.f32 %v712_v5, %v3196_v46  ;;  %v874_v12 = vadd.f32 %v2240_v6, %v3235_v4 }
 0x1a6   : > { %v716_v9 = vpop.f32.mrb[18].mxu0  ;;  %v2241_v10 = vpop.f32.mrb[18].mxu1  ;;  %v715_v44 = vadd.f32 %v714_v7, %v3199_v49  ;;  %v866_v17 = vadd.f32 %v865_v8, %v3235_v4 }
 0x1a7   : > { %v717_v13 = vadd.f32 %v716_v9, %v3196_v46  ;;  %v877_v14 = vadd.f32 %v2241_v10, %v3235_v4  ;;  %v718_v15 = vpop.f32.mrb[19].mxu0  ;;  %v868_v16 = vpop.f32.mrb[19].mxu1 }
 0x1a8   : > { %v719_v18 = vadd.f32 %v718_v15, %v3199_v49  ;;  %v869_v19 = vadd.f32 %v868_v16, %v3235_v4 }
 0x1a9   : > { %v1004_v20 = vpack.c.bf16 %v717_v13, %v713_v11  ;;  %v997_v21 = vpack.c.bf16 %v877_v14, %v874_v12 }
 0x1aa   : > { %v1005_v22 = vpack.c.bf16 %v719_v18, %v715_v44  ;;  %v994_v23 = vpack.c.bf16 %v869_v19, %v866_v17 }
 0x1ab   : > { %1044 = vst [vmem:[#allocation2 + $0x20] sm:$0xff] %v1004_v20  ;;  %1073 = vst [vmem:[#allocation4 + $0x8] sm:$0xff] %v997_v21 }
 0x1ac   : > { %1060 = vst [vmem:[#allocation3 + $0x20] sm:$0xff] %v1005_v22  ;;  %1072 = vst [vmem:[#allocation4] sm:$0xff] %v994_v23  ;;  %v722_v24 = vpop.f32.mrb[20].mxu0  ;;  %v2244_v25 = vpop.f32.mrb[20].mxu1 }
 0x1ad   : > { %v724_v26 = vpop.f32.mrb[21].mxu0  ;;  %v881_v27 = vpop.f32.mrb[21].mxu1  ;;  %v723_v30 = vadd.f32 %v722_v24, %v3196_v46  ;;  %v890_v31 = vadd.f32 %v2244_v25, %v3235_v4 }
 0x1ae   : > { %v726_v28 = vpop.f32.mrb[22].mxu0  ;;  %v2245_v29 = vpop.f32.mrb[22].mxu1  ;;  %v725_v36 = vadd.f32 %v724_v26, %v3199_v49  ;;  %v882_v37 = vadd.f32 %v881_v27, %v3235_v4 }
 0x1af   : > { %v727_v32 = vadd.f32 %v726_v28, %v3196_v46  ;;  %v893_v33 = vadd.f32 %v2245_v29, %v3235_v4  ;;  %v728_v34 = vpop.f32.mrb[23].mxu0  ;;  %v884_v35 = vpop.f32.mrb[23].mxu1 }
 0x1b0   : > { %v729_v38 = vadd.f32 %v728_v34, %v3199_v49  ;;  %v885_v39 = vadd.f32 %v884_v35, %v3235_v4 }
 0x1b1   : > { %v1007_v40 = vpack.c.bf16 %v727_v32, %v723_v30  ;;  %v1003_v41 = vpack.c.bf16 %v893_v33, %v890_v31 }
 0x1b2   : > { %v1008_v43 = vpack.c.bf16 %v729_v38, %v725_v36  ;;  %v1000_v45 = vpack.c.bf16 %v885_v39, %v882_v37 }
 0x1b3   : > { %1045 = vst [vmem:[#allocation2 + $0x28] sm:$0xff] %v1007_v40  ;;  %1075 = vst [vmem:[#allocation4 + $0x18] sm:$0xff] %v1003_v41 }
 0x1b4   : > { %1061 = vst [vmem:[#allocation3 + $0x28] sm:$0xff] %v1008_v43  ;;  %1074 = vst [vmem:[#allocation4 + $0x10] sm:$0xff] %v1000_v45  ;;  %v732_v47 = vpop.f32.mrb[24].mxu0  ;;  %v2248_v48 = vpop.f32.mrb[24].mxu1 }
 0x1b5   : > { %v734_v50 = vpop.f32.mrb[25].mxu0  ;;  %v897_v51 = vpop.f32.mrb[25].mxu1  ;;  %v733_v54 = vadd.f32 %v732_v47, %v3196_v46  ;;  %v906_v55 = vadd.f32 %v2248_v48, %v3235_v4 }
 0x1b6   : > { %v736_v52 = vpop.f32.mrb[26].mxu0  ;;  %v2249_v53 = vpop.f32.mrb[26].mxu1  ;;  %v735_v60 = vadd.f32 %v734_v50, %v3199_v49  ;;  %v898_v61 = vadd.f32 %v897_v51, %v3235_v4 }
 0x1b7   : > { %v737_v56 = vadd.f32 %v736_v52, %v3196_v46  ;;  %v909_v57 = vadd.f32 %v2249_v53, %v3235_v4  ;;  %v738_v58 = vpop.f32.mrb[27].mxu0  ;;  %v900_v59 = vpop.f32.mrb[27].mxu1 }
 0x1b8   : > { %v739_v62 = vadd.f32 %v738_v58, %v3199_v49  ;;  %v901_v63 = vadd.f32 %v900_v59, %v3235_v4 }
 0x1b9   : > { %v1010_v0 = vpack.c.bf16 %v737_v56, %v733_v54  ;;  %v1009_v1 = vpack.c.bf16 %v909_v57, %v906_v55 }
 0x1ba   : > { %v1011_v42 = vpack.c.bf16 %v739_v62, %v735_v60  ;;  %v1006_v2 = vpack.c.bf16 %v901_v63, %v898_v61 }
 0x1bb   : > { %1046 = vst [vmem:[#allocation2 + $0x30] sm:$0xff] %v1010_v0  ;;  %1077 = vst [vmem:[#allocation4 + $0x28] sm:$0xff] %v1009_v1 }
 0x1bc   : > { %1062 = vst [vmem:[#allocation3 + $0x30] sm:$0xff] %v1011_v42  ;;  %1076 = vst [vmem:[#allocation4 + $0x20] sm:$0xff] %v1006_v2  ;;  %v742_v3 = vpop.f32.mrb[28].mxu0  ;;  %v2252_v5 = vpop.f32.mrb[28].mxu1 }
 0x1bd   : > { %v744_v6 = vpop.f32.mrb[29].mxu0  ;;  %v913_v7 = vpop.f32.mrb[29].mxu1  ;;  %v743_v10 = vadd.f32 %v742_v3, %v3196_v46  ;;  %v922_v11 = vadd.f32 %v2252_v5, %v3235_v4 }
 0x1be   : > { %v746_v8 = vpop.f32.mrb[30].mxu0  ;;  %v2253_v9 = vpop.f32.mrb[30].mxu1  ;;  %v745_v16 = vadd.f32 %v744_v6, %v3199_v49  ;;  %v914_v44 = vadd.f32 %v913_v7, %v3235_v4 }
 0x1bf   : > { %v747_v12 = vadd.f32 %v746_v8, %v3196_v46  ;;  %v925_v13 = vadd.f32 %v2253_v9, %v3235_v4  ;;  %v748_v14 = vpop.f32.mrb[31].mxu0  ;;  %v916_v15 = vpop.f32.mrb[31].mxu1 }
 0x1c0   : > { %v749_v17 = vadd.f32 %v748_v14, %v3199_v49  ;;  %v917_v18 = vadd.f32 %v916_v15, %v3235_v4 }
 0x1c1   : > { %v1013_v19 = vpack.c.bf16 %v747_v12, %v743_v10  ;;  %v1015_v20 = vpack.c.bf16 %v925_v13, %v922_v11 }
 0x1c2   : > { %v1014_v21 = vpack.c.bf16 %v749_v17, %v745_v16  ;;  %v1012_v22 = vpack.c.bf16 %v917_v18, %v914_v44 }
 0x1c3   : > { %1047 = vst [vmem:[#allocation2 + $0x38] sm:$0xff] %v1013_v19  ;;  %1079 = vst [vmem:[#allocation4 + $0x38] sm:$0xff] %v1015_v20 }
 0x1c4   : > { %1063 = vst [vmem:[#allocation3 + $0x38] sm:$0xff] %v1014_v21  ;;  %1078 = vst [vmem:[#allocation4 + $0x30] sm:$0xff] %v1012_v22  ;;  %v752_v23 = vpop.f32.mrb[32].mxu0  ;;  %v2256_v24 = vpop.f32.mrb[32].mxu1 }
 0x1c5   : > { %v754_v25 = vpop.f32.mrb[33].mxu0  ;;  %v929_v26 = vpop.f32.mrb[33].mxu1  ;;  %v753_v29 = vadd.f32 %v752_v23, %v3196_v46  ;;  %v938_v30 = vadd.f32 %v2256_v24, %v3235_v4 }
 0x1c6   : > { %v756_v27 = vpop.f32.mrb[34].mxu0  ;;  %v2257_v28 = vpop.f32.mrb[34].mxu1  ;;  %v755_v35 = vadd.f32 %v754_v25, %v3199_v49  ;;  %v930_v36 = vadd.f32 %v929_v26, %v3235_v4 }
 0x1c7   : > { %v757_v31 = vadd.f32 %v756_v27, %v3196_v46  ;;  %v941_v32 = vadd.f32 %v2257_v28, %v3235_v4  ;;  %v758_v33 = vpop.f32.mrb[35].mxu0  ;;  %v932_v34 = vpop.f32.mrb[35].mxu1 }
 0x1c8   : > { %v759_v37 = vadd.f32 %v758_v33, %v3199_v49  ;;  %v933_v38 = vadd.f32 %v932_v34, %v3235_v4 }
 0x1c9   : > { %v1016_v39 = vpack.c.bf16 %v757_v31, %v753_v29  ;;  %v1021_v40 = vpack.c.bf16 %v941_v32, %v938_v30 }
 0x1ca   : > { %v1017_v41 = vpack.c.bf16 %v759_v37, %v755_v35  ;;  %v1018_v43 = vpack.c.bf16 %v933_v38, %v930_v36 }
 0x1cb   : > { %1048 = vst [vmem:[#allocation2 + $0x40] sm:$0xff] %v1016_v39  ;;  %1081 = vst [vmem:[#allocation4 + $0x48] sm:$0xff] %v1021_v40 }
 0x1cc   : > { %1064 = vst [vmem:[#allocation3 + $0x40] sm:$0xff] %v1017_v41  ;;  %1080 = vst [vmem:[#allocation4 + $0x40] sm:$0xff] %v1018_v43  ;;  %v762_v45 = vpop.f32.mrb[36].mxu0  ;;  %v2260_v47 = vpop.f32.mrb[36].mxu1 }
 0x1cd   : > { %v764_v48 = vpop.f32.mrb[37].mxu0  ;;  %v945_v50 = vpop.f32.mrb[37].mxu1  ;;  %v763_v53 = vadd.f32 %v762_v45, %v3196_v46  ;;  %v954_v54 = vadd.f32 %v2260_v47, %v3235_v4 }
 0x1ce   : > { %v766_v51 = vpop.f32.mrb[38].mxu0  ;;  %v2261_v52 = vpop.f32.mrb[38].mxu1  ;;  %v765_v59 = vadd.f32 %v764_v48, %v3199_v49  ;;  %v946_v60 = vadd.f32 %v945_v50, %v3235_v4 }
 0x1cf   : > { %v767_v55 = vadd.f32 %v766_v51, %v3196_v46  ;;  %v957_v56 = vadd.f32 %v2261_v52, %v3235_v4  ;;  %v768_v57 = vpop.f32.mrb[39].mxu0  ;;  %v948_v58 = vpop.f32.mrb[39].mxu1 }
 0x1d0   : > { %v769_v61 = vadd.f32 %v768_v57, %v3199_v49  ;;  %v949_v62 = vadd.f32 %v948_v58, %v3235_v4 }
 0x1d1   : > { %v1019_v63 = vpack.c.bf16 %v767_v55, %v763_v53  ;;  %v1027_v0 = vpack.c.bf16 %v957_v56, %v954_v54 }
 0x1d2   : > { %v1020_v1 = vpack.c.bf16 %v769_v61, %v765_v59  ;;  %v1024_v42 = vpack.c.bf16 %v949_v62, %v946_v60 }
 0x1d3   : > { %1049 = vst [vmem:[#allocation2 + $0x48] sm:$0xff] %v1019_v63  ;;  %1083 = vst [vmem:[#allocation4 + $0x58] sm:$0xff] %v1027_v0 }
 0x1d4   : > { %1065 = vst [vmem:[#allocation3 + $0x48] sm:$0xff] %v1020_v1  ;;  %1082 = vst [vmem:[#allocation4 + $0x50] sm:$0xff] %v1024_v42  ;;  %v772_v2 = vpop.f32.mrb[40].mxu0  ;;  %v2264_v3 = vpop.f32.mrb[40].mxu1 }
 0x1d5   : > { %v774_v5 = vpop.f32.mrb[41].mxu0  ;;  %v961_v6 = vpop.f32.mrb[41].mxu1  ;;  %v773_v9 = vadd.f32 %v772_v2, %v3196_v46  ;;  %v970_v10 = vadd.f32 %v2264_v3, %v3235_v4 }
 0x1d6   : > { %v776_v7 = vpop.f32.mrb[42].mxu0  ;;  %v2265_v8 = vpop.f32.mrb[42].mxu1  ;;  %v775_v15 = vadd.f32 %v774_v5, %v3199_v49  ;;  %v962_v16 = vadd.f32 %v961_v6, %v3235_v4 }
 0x1d7   : > { %v777_v11 = vadd.f32 %v776_v7, %v3196_v46  ;;  %v973_v12 = vadd.f32 %v2265_v8, %v3235_v4  ;;  %v778_v13 = vpop.f32.mrb[43].mxu0  ;;  %v964_v14 = vpop.f32.mrb[43].mxu1 }
 0x1d8   : > { %v779_v44 = vadd.f32 %v778_v13, %v3199_v49  ;;  %v965_v17 = vadd.f32 %v964_v14, %v3235_v4 }
 0x1d9   : > { %v1022_v18 = vpack.c.bf16 %v777_v11, %v773_v9  ;;  %v1033_v19 = vpack.c.bf16 %v973_v12, %v970_v10 }
 0x1da   : > { %v1023_v20 = vpack.c.bf16 %v779_v44, %v775_v15  ;;  %v1030_v21 = vpack.c.bf16 %v965_v17, %v962_v16 }
 0x1db   : > { %1050 = vst [vmem:[#allocation2 + $0x50] sm:$0xff] %v1022_v18  ;;  %1085 = vst [vmem:[#allocation4 + $0x68] sm:$0xff] %v1033_v19 }
 0x1dc   : > { %1066 = vst [vmem:[#allocation3 + $0x50] sm:$0xff] %v1023_v20  ;;  %1084 = vst [vmem:[#allocation4 + $0x60] sm:$0xff] %v1030_v21  ;;  %v782_v22 = vpop.f32.mrb[44].mxu0  ;;  %v2268_v23 = vpop.f32.mrb[44].mxu1 }
 0x1dd   : > { %v784_v24 = vpop.f32.mrb[45].mxu0  ;;  %v977_v25 = vpop.f32.mrb[45].mxu1  ;;  %v783_v28 = vadd.f32 %v782_v22, %v3196_v46  ;;  %v986_v29 = vadd.f32 %v2268_v23, %v3235_v4 }
 0x1de   : > { %v786_v26 = vpop.f32.mrb[46].mxu0  ;;  %v2269_v27 = vpop.f32.mrb[46].mxu1  ;;  %v785_v34 = vadd.f32 %v784_v24, %v3199_v49  ;;  %v978_v35 = vadd.f32 %v977_v25, %v3235_v4 }
 0x1df   : > { %v787_v30 = vadd.f32 %v786_v26, %v3196_v46  ;;  %v989_v31 = vadd.f32 %v2269_v27, %v3235_v4  ;;  %v788_v32 = vpop.f32.mrb[47].mxu0  ;;  %v980_v33 = vpop.f32.mrb[47].mxu1 }
 0x1e0   : > { %v789_v36 = vadd.f32 %v788_v32, %v3199_v49  ;;  %v981_v37 = vadd.f32 %v980_v33, %v3235_v4 }
 0x1e1   : > { %v1025_v38 = vpack.c.bf16 %v787_v30, %v783_v28  ;;  %v1039_v39 = vpack.c.bf16 %v989_v31, %v986_v29 }
 0x1e2   : > { %v1026_v40 = vpack.c.bf16 %v789_v36, %v785_v34  ;;  %v1036_v41 = vpack.c.bf16 %v981_v37, %v978_v35 }
 0x1e3   : > { %1051 = vst [vmem:[#allocation2 + $0x58] sm:$0xff] %v1025_v38  ;;  %1087 = vst [vmem:[#allocation4 + $0x78] sm:$0xff] %v1039_v39 }
 0x1e4   : > { %1067 = vst [vmem:[#allocation3 + $0x58] sm:$0xff] %v1026_v40  ;;  %1086 = vst [vmem:[#allocation4 + $0x70] sm:$0xff] %v1036_v41 }
 0x1e5 PF: > { %v1109_v46 = vld [vmem:[#allocation3 + $0x40] sm:$0xff]  ;;  %v1110_v45 = vld [vmem:[#allocation3 + $0x48] sm:$0xff]  ;;  %s2062_s20 = sshll.u32 %s2835_s27, 7  ;;  %v1111_v47 = vld [vmem:[#allocation3 + $0x50] sm:$0xff]  ;;  %s2085_s14 = sshll.u32 %s2835_s27, 5 }
 0x1e6   : > { %v1101_v43 = vld [vmem:[#allocation3] sm:$0xff]  ;;  %2110 = vmatprep.subr.bf16.mxu0 %v1109_v46  ;;  %s1089_s17 = sshra.s32 %s2062_s20, 4  ;;  %v1102_v4 = vld [vmem:[#allocation3 + $0x8] sm:$0xff]  ;;  %v1103_v48 = vld [vmem:[#allocation3 + $0x10] sm:$0xff]  ;;  %s2080_s1 = sshll.u32 %s2839_s28, 6 }
 0x1e7   : > { %2111 = vmatpush3.bf16.xpose.msra.mxu0 %v1101_v43  ;;  %s2063_s6 = sshll.u32 %s1089_s17, 3  ;;  %v1104_v51 = vld [vmem:[#allocation3 + $0x18] sm:$0xff]  ;;  %v1113_v52 = vld [vmem:[#allocation3 + $0x60] sm:$0xff]  ;;  %v1114_v54 = vld [vmem:[#allocation3 + $0x68] sm:$0xff]  ;;  %s1863_s24 = sshll.u32 %s3143_s9, 4  ;;  %s3603_s24 = int_to_ptr.vmem [resolvable:$true] %s1863_s24 }
 0x1e8   : > { %2112 = vmatprep.subr.bf16.mxu0 %v1110_v45  ;;  %s3302_s11 = scalar_lea.vmem [#allocation2], %s2063_s6  ;;  %v1105_v53 = vld [vmem:[#allocation3 + $0x20] sm:$0xff]  ;;  %v1106_v55 = vld [vmem:[#allocation3 + $0x28] sm:$0xff]  ;;  %v1115_v56 = vld [vmem:[#allocation3 + $0x70] sm:$0xff]  ;;  %s1860_s18 = sadd.s32 %s2085_s14, %s2080_s1 }
 0x1e9   : > { %v1107_v57 = vld [vmem:[#allocation3 + $0x30] sm:$0xff]  ;;  %v1116_v58 = vld [vmem:[#allocation3 + $0x78] sm:$0xff]  ;;  %s2081_s16 = sshll.u32 %s1860_s18, 7  ;;  %s3769_s4 = sld [smem:[#allocation26_spill]] }
 0x1ea   : > { %v1093_v49 = vld [vmem:[%s3302_s11] sm:$0xff]  ;;  %v1108_v59 = vld [vmem:[#allocation3 + $0x38] sm:$0xff]  ;;  %v1094_v60 = vld [vmem:[%s3302_s11 + $0x8] sm:$0xff]  ;;  %s1829_s12 = scalar_lea.sflag [#allocation13], %s3137_s29  ;;  %s2693_s20 = scalar_lea.vmem %s3603_s24, 4096 }
 0x1eb   : > { %2126 = vmatprep.mubr.bf16.mxu0 %v1093_v49  ;;  %v1112_v50 = vld [vmem:[#allocation3 + $0x58] sm:$0xff]  ;;  %v1095_v61 = vld [vmem:[%s3302_s11 + $0x10] sm:$0xff]  ;;  %v1097_v63 = vld [vmem:[%s3302_s11 + $0x20] sm:$0xff]  ;;  %p2694_p1 = scmp.ne.s32.totalorder %s3603_s24, %s2693_s20  ;;  %p3770_p3 = scmp.ne.s32.totalorder %s3753_s13, 0 }
 0x1ec   : > { %v1096_v62 = vld [vmem:[%s3302_s11 + $0x18] sm:$0xff]  ;;  %v1098_v0 = vld [vmem:[%s3302_s11 + $0x28] sm:$0xff]  ;;  %v1099_v1 = vld [vmem:[%s3302_s11 + $0x30] sm:$0xff]  ;;  %s2861_s17 = smov [#allocation12]  }
 0x1ed   : > { %v1100_v42 = vld [vmem:[%s3302_s11 + $0x38] sm:$0xff]  ;;  %p2695_p13 = pnand %p2694_p1, %p3770_p3 }
 0x1ef   : > { %2113 = vmatpush3.bf16.xpose.msra.mxu0 %v1102_v4  ;;  %s3608_s10 = scalar_lea.hbm %s3769_s4, %s2081_s16  ;;  %p2696_p7 = pneg %p2695_p13 }
 0x1f0   : > { %2114 = vmatprep.subr.bf16.mxu0 %v1111_v47 }
 0x1f7   : > { %2115 = vmatpush3.bf16.xpose.msra.mxu0 %v1103_v48 }
 0x1f8   : > { %2116 = vmatprep.subr.bf16.mxu0 %v1112_v50 }
 0x1ff   : > { %2117 = vmatpush3.bf16.xpose.msra.mxu0 %v1104_v51  ;;  %v1494_v51 = vld [vmem:[#allocation4 + $0x40] sm:$0xff] }
 0x200   : > { %2118 = vmatprep.subr.bf16.mxu0 %v1113_v52  ;;  %v1486_v52 = vld [vmem:[#allocation4] sm:$0xff]  ;;  %2142 = vmatprep.subr.bf16.mxu1 %v1494_v51 }
 0x201   : > { %2143 = vmatpush3.bf16.msra.mxu1 %v1486_v52 }
 0x207   : > { %2119 = vmatpush3.bf16.xpose.msra.mxu0 %v1105_v53  ;;  %v1495_v53 = vld [vmem:[#allocation4 + $0x48] sm:$0xff] }
 0x208   : > { %2120 = vmatprep.subr.bf16.mxu0 %v1114_v54  ;;  %2144 = vmatprep.subr.bf16.mxu1 %v1495_v53  ;;  %v1487_v54 = vld [vmem:[#allocation4 + $0x8] sm:$0xff] }
 0x209   : > { %2145 = vmatpush3.bf16.msra.mxu1 %v1487_v54 }
 0x20f   : > { %2121 = vmatpush3.bf16.xpose.msra.mxu0 %v1106_v55  ;;  %v1496_v55 = vld [vmem:[#allocation4 + $0x50] sm:$0xff] }
 0x210   : > { %2122 = vmatprep.subr.bf16.mxu0 %v1115_v56  ;;  %2146 = vmatprep.subr.bf16.mxu1 %v1496_v55  ;;  %v1488_v56 = vld [vmem:[#allocation4 + $0x10] sm:$0xff] }
 0x211   : > { %2147 = vmatpush3.bf16.msra.mxu1 %v1488_v56 }
 0x217   : > { %2123 = vmatpush3.bf16.xpose.msra.mxu0 %v1107_v57 }
 0x218   : > { %2124 = vmatprep.subr.bf16.mxu0 %v1116_v58 }
 0x21f   : > { %2125 = vmatpush3.bf16.xpose.msra.mxu0 %v1108_v59 }
 0x226   : > { %2127 = vmatmul.mubr.bf16.vlgmr.msra.gmra.mrb[0].mxu0 %v1093_v49 }
 0x227   : > { %2128 = vmatprep.mubr.bf16.mxu0 %v1094_v60 }
 0x22e   : > { %2129 = vmatmul.mubr.bf16.gmra.mrb[4].mxu0 %v1094_v60 }
 0x22f   : > { %2130 = vmatprep.mubr.bf16.mxu0 %v1095_v61 }
 0x236   : > { %2131 = vmatmul.mubr.bf16.gmra.mrb[8].mxu0 %v1095_v61 }
 0x237   : > { %2132 = vmatprep.mubr.bf16.mxu0 %v1096_v62 }
 0x23e   : > { %2133 = vmatmul.mubr.bf16.gmra.mrb[12].mxu0 %v1096_v62 }
 0x23f   : > { %2134 = vmatprep.mubr.bf16.mxu0 %v1097_v63 }
 0x246   : > { %2135 = vmatmul.mubr.bf16.gmra.mrb[16].mxu0 %v1097_v63 }
 0x247   : > { %2136 = vmatprep.mubr.bf16.mxu0 %v1098_v0 }
 0x24e   : > { %2137 = vmatmul.mubr.bf16.gmra.mrb[20].mxu0 %v1098_v0 }
 0x24f   : > { %2138 = vmatprep.mubr.bf16.mxu0 %v1099_v1 }
 0x256   : > { %2139 = vmatmul.mubr.bf16.gmra.mrb[24].mxu0 %v1099_v1 }
 0x257   : > { %2140 = vmatprep.mubr.bf16.mxu0 %v1100_v42 }
 0x25e   : > { %2141 = vmatmul.mubr.bf16.gmra.mrb[28].mxu0 %v1100_v42 }
 0x2f9   : > { %v3312_v2 = vpop.f32.mrb[0].mxu0 }
 0x2fa   : > { %v3314_v3 = vpop.f32.mrb[1].mxu0 }
 0x2fb   : > { %v3316_v5 = vpop.f32.mrb[2].mxu0  ;;  %v1230_v6 = vmax.f32 %v3312_v2, %v3314_v3 }
 0x2fc   : > { %v3320_v7 = vpop.f32.mrb[3].mxu0 }
 0x2fd   : > { %1231 = vmax.xlane.f32.xlu0 %v1230_v6  ;;  %v1233_v8 = vmax.f32 %v3316_v5, %v3320_v7 }
 0x301   : > { %1234 = vmax.xlane.f32.xlu0 %v1233_v8  ;;  %v3324_v9 = vpop.f32.mrb[4].mxu0 }
 0x302   : > { %v3326_v10 = vpop.f32.mrb[5].mxu0 }
 0x303   : > { %v3328_v11 = vpop.f32.mrb[6].mxu0  ;;  %v1236_v12 = vmax.f32 %v3324_v9, %v3326_v10 }
 0x304   : > { %v3332_v13 = vpop.f32.mrb[7].mxu0 }
 0x305   : > { %1237 = vmax.xlane.f32.xlu1 %v1236_v12  ;;  %v1239_v14 = vmax.f32 %v3328_v11, %v3332_v13 }
 0x309   : > { %1240 = vmax.xlane.f32.xlu1 %v1239_v14  ;;  %v3336_v15 = vpop.f32.mrb[8].mxu0 }
 0x30a   : > { %v3338_v16 = vpop.f32.mrb[9].mxu0 }
 0x30b   : > { %v3340_v44 = vpop.f32.mrb[10].mxu0  ;;  %v1242_v17 = vmax.f32 %v3336_v15, %v3338_v16 }
 0x30c   : > { %v3344_v18 = vpop.f32.mrb[11].mxu0 }
 0x30d   : > { %1243 = vmax.xlane.f32.xlu0 %v1242_v17  ;;  %v1245_v19 = vmax.f32 %v3340_v44, %v3344_v18 }
 0x30f   : > { %1246 = vmax.xlane.f32.xlu1 %v1245_v19 }
 0x311   : > { %v3348_v20 = vpop.f32.mrb[12].mxu0 }
 0x312   : > { %v3350_v21 = vpop.f32.mrb[13].mxu0 }
 0x313   : > { %v3352_v22 = vpop.f32.mrb[14].mxu0  ;;  %v1248_v23 = vmax.f32 %v3348_v20, %v3350_v21 }
 0x314   : > { %v3356_v24 = vpop.f32.mrb[15].mxu0 }
 0x315   : > { %1249 = vmax.xlane.f32.xlu0 %v1248_v23  ;;  %v1251_v25 = vmax.f32 %v3352_v22, %v3356_v24 }
 0x317   : > { %1252 = vmax.xlane.f32.xlu1 %v1251_v25 }
 0x319   : > { %v3360_v26 = vpop.f32.mrb[16].mxu0 }
 0x31a   : > { %v3362_v27 = vpop.f32.mrb[17].mxu0 }
 0x31b   : > { %v3364_v28 = vpop.f32.mrb[18].mxu0  ;;  %v1254_v29 = vmax.f32 %v3360_v26, %v3362_v27 }
 0x31c   : > { %v3368_v30 = vpop.f32.mrb[19].mxu0 }
 0x31d   : > { %1255 = vmax.xlane.f32.xlu0 %v1254_v29  ;;  %v1257_v31 = vmax.f32 %v3364_v28, %v3368_v30 }
 0x31f   : > { %1258 = vmax.xlane.f32.xlu1 %v1257_v31 }
 0x321   : > { %v3372_v32 = vpop.f32.mrb[20].mxu0 }
 0x322   : > { %v3374_v33 = vpop.f32.mrb[21].mxu0 }
 0x323   : > { %v3376_v34 = vpop.f32.mrb[22].mxu0  ;;  %v1260_v35 = vmax.f32 %v3372_v32, %v3374_v33 }
 0x324   : > { %v3380_v36 = vpop.f32.mrb[23].mxu0 }
 0x325   : > { %1261 = vmax.xlane.f32.xlu0 %v1260_v35  ;;  %v1263_v37 = vmax.f32 %v3376_v34, %v3380_v36 }
 0x327   : > { %1264 = vmax.xlane.f32.xlu1 %v1263_v37 }
 0x329   : > { %v3384_v38 = vpop.f32.mrb[24].mxu0 }
 0x32a   : > { %v3386_v39 = vpop.f32.mrb[25].mxu0 }
 0x32b   : > { %v3388_v40 = vpop.f32.mrb[26].mxu0  ;;  %v1266_v41 = vmax.f32 %v3384_v38, %v3386_v39 }
 0x32c   : > { %v3392_v46 = vpop.f32.mrb[27].mxu0 }
 0x32d   : > { %1267 = vmax.xlane.f32.xlu0 %v1266_v41  ;;  %v1269_v43 = vmax.f32 %v3388_v40, %v3392_v46 }
 0x32f   : > { %1270 = vmax.xlane.f32.xlu1 %v1269_v43 }
 0x331   : > { %v3396_v45 = vpop.f32.mrb[28].mxu0 }
 0x332   : > { %v3398_v49 = vpop.f32.mrb[29].mxu0 }
 0x333   : > { %v3400_v4 = vpop.f32.mrb[30].mxu0  ;;  %v1272_v47 = vmax.f32 %v3396_v45, %v3398_v49 }
 0x334   : > { %v3404_v48 = vpop.f32.mrb[31].mxu0 }
 0x335   : > { %v1275_v50 = vmax.f32 %v3400_v4, %v3404_v48  ;;  %1273 = vmax.xlane.f32.xlu0 %v1272_v47 }
 0x337   : > { %1276 = vmax.xlane.f32.xlu1 %v1275_v50 }
 0x38a   : > { %v1232_v57 = vpop.xlane.xlu0 %1231 }
 0x38b   : > { %v1278_v58 = vsub.f32 %v3312_v2, %v1232_v57  ;;  %v1279_v59 = vsub.f32 %v3314_v3, %v1232_v57 }
 0x38d   : > { %v1310_v60 = vmul.f32 1.442695, %v1278_v58  ;;  %v1312_v61 = vmul.f32 1.442695, %v1279_v59 }
 0x38e   : > { %v1235_v62 = vpop.xlane.xlu0 %1234 }
 0x38f   : > { %2511 = vpow2.f32 %v1310_v60  ;;  %v1280_v63 = vsub.f32 %v3316_v5, %v1235_v62  ;;  %v1281_v0 = vsub.f32 %v3320_v7, %v1235_v62 }
 0x390   : > { %2513 = vpow2.f32 %v1312_v61 }
 0x391   : > { %v1314_v1 = vmul.f32 1.442695, %v1280_v63  ;;  %v1316_v42 = vmul.f32 1.442695, %v1281_v0 }
 0x392   : > { %v1238_v6 = vpop.xlane.xlu1 %1237 }
 0x393   : > { %2515 = vpow2.f32 %v1314_v1  ;;  %v1282_v8 = vsub.f32 %v3324_v9, %v1238_v6  ;;  %v1283_v12 = vsub.f32 %v3326_v10, %v1238_v6 }
 0x394   : > { %2517 = vpow2.f32 %v1316_v42 }
 0x395   : > { %v1318_v2 = vmul.f32 1.442695, %v1282_v8  ;;  %v1320_v3 = vmul.f32 1.442695, %v1283_v12  ;;  %v1497_v8 = vld [vmem:[#allocation4 + $0x58] sm:$0xff] }
 0x396   : > { %v1241_v14 = vpop.xlane.xlu1 %1240  ;;  %v1489_v12 = vld [vmem:[#allocation4 + $0x18] sm:$0xff]  ;;  %2148 = vmatprep.subr.bf16.mxu1 %v1497_v8 }
 0x397   : > { %2519 = vpow2.f32 %v1318_v2  ;;  %v1284_v17 = vsub.f32 %v3328_v11, %v1241_v14  ;;  %v1285_v5 = vsub.f32 %v3332_v13, %v1241_v14  ;;  %2149 = vmatpush3.bf16.msra.mxu1 %v1489_v12 }
 0x398   : > { %2521 = vpow2.f32 %v1320_v3 }
 0x399   : > { %v3416_v7 = vpop.eup %2511  ;;  %v1322_v19 = vmul.f32 1.442695, %v1284_v17  ;;  %v1324_v23 = vmul.f32 1.442695, %v1285_v5 }
 0x39a   : > { %v3418_v25 = vpop.eup %2513  ;;  %v1244_v29 = vpop.xlane.xlu0 %1243 }
 0x39b   : > { %2523 = vpow2.f32 %v1322_v19  ;;  %v1286_v9 = vsub.f32 %v3336_v15, %v1244_v29  ;;  %v1287_v10 = vsub.f32 %v3338_v16, %v1244_v29  ;;  %v1374_v31 = vadd.f32 %v3418_v25, %v3416_v7  ;;  %v1498_v29 = vld [vmem:[#allocation4 + $0x60] sm:$0xff] }
 0x39c   : > { %2525 = vpow2.f32 %v1324_v23  ;;  %v1247_v11 = vpop.xlane.xlu1 %1246  ;;  %2150 = vmatprep.subr.bf16.mxu1 %v1498_v29 }
 0x39d   : > { %v3424_v35 = vpop.eup %2515  ;;  %v1326_v13 = vmul.f32 1.442695, %v1286_v9  ;;  %v1328_v37 = vmul.f32 1.442695, %v1287_v10  ;;  %v1288_v41 = vsub.f32 %v3340_v44, %v1247_v11  ;;  %v1289_v43 = vsub.f32 %v3344_v18, %v1247_v11  ;;  %1375 = vadd.xlane.f32.xlu0 %v1374_v31  ;;  %v1490_v9 = vld [vmem:[#allocation4 + $0x20] sm:$0xff] }
 0x39e   : > { %v3428_v47 = vpop.eup %2517  ;;  %2151 = vmatpush3.bf16.msra.mxu1 %v1490_v9 }
 0x39f   : > { %2527 = vpow2.f32 %v1326_v13  ;;  %v1330_v15 = vmul.f32 1.442695, %v1288_v41  ;;  %v1332_v50 = vmul.f32 1.442695, %v1289_v43  ;;  %v1377_v16 = vadd.f32 %v3428_v47, %v3424_v35  ;;  %v1499_v41 = vld [vmem:[#allocation4 + $0x68] sm:$0xff] }
 0x3a0   : > { %2529 = vpow2.f32 %v1328_v37  ;;  %v1491_v43 = vld [vmem:[#allocation4 + $0x28] sm:$0xff]  ;;  %2152 = vmatprep.subr.bf16.mxu1 %v1499_v41 }
 0x3a1   : > { %v3432_v51 = vpop.eup %2519  ;;  %2531 = vpow2.f32 %v1330_v15  ;;  %1378 = vadd.xlane.f32.xlu1 %v1377_v16 }
 0x3a2   : > { %v3434_v52 = vpop.eup %2521  ;;  %2533 = vpow2.f32 %v1332_v50  ;;  %v1250_v44 = vpop.xlane.xlu0 %1249  ;;  %2153 = vmatpush3.bf16.msra.mxu1 %v1491_v43 }
 0x3a3   : > { %v1290_v18 = vsub.f32 %v3348_v20, %v1250_v44  ;;  %v1291_v53 = vsub.f32 %v3350_v21, %v1250_v44  ;;  %v1380_v54 = vadd.f32 %v3434_v52, %v3432_v51 }
 0x3a4   : > { %v1253_v55 = vpop.xlane.xlu1 %1252 }
 0x3a5   : > { %v3440_v56 = vpop.eup %2523  ;;  %v1334_v57 = vmul.f32 1.442695, %v1290_v18  ;;  %v1336_v58 = vmul.f32 1.442695, %v1291_v53  ;;  %v1292_v59 = vsub.f32 %v3352_v22, %v1253_v55  ;;  %v1293_v60 = vsub.f32 %v3356_v24, %v1253_v55  ;;  %1381 = vadd.xlane.f32.xlu0 %v1380_v54  ;;  %v1500_v55 = vld [vmem:[#allocation4 + $0x70] sm:$0xff] }
 0x3a6   : > { %v3444_v61 = vpop.eup %2525  ;;  %2154 = vmatprep.subr.bf16.mxu1 %v1500_v55  ;;  %v2503_v55 = vld [vmem:[#allocation10] sm:$0xff]  }
 0x3a7   : > { %2535 = vpow2.f32 %v1334_v57  ;;  %v1338_v62 = vmul.f32 1.442695, %v1292_v59  ;;  %v1340_v20 = vmul.f32 1.442695, %v1293_v60  ;;  %v1383_v21 = vadd.f32 %v3444_v61, %v3440_v56  ;;  %v1492_v57 = vld [vmem:[#allocation4 + $0x30] sm:$0xff] }
 0x3a8   : > { %2537 = vpow2.f32 %v1336_v58  ;;  %2155 = vmatpush3.bf16.msra.mxu1 %v1492_v57 }
 0x3a9   : > { %v3448_v63 = vpop.eup %2527  ;;  %2539 = vpow2.f32 %v1338_v62  ;;  %1384 = vadd.xlane.f32.xlu1 %v1383_v21  ;;  %v1501_v21 = vld [vmem:[#allocation4 + $0x78] sm:$0xff] }
 0x3aa   : > { %v3450_v0 = vpop.eup %2529  ;;  %2541 = vpow2.f32 %v1340_v20  ;;  %v1256_v22 = vpop.xlane.xlu0 %1255  ;;  %2156 = vmatprep.subr.bf16.mxu1 %v1501_v21 }
 0x3ab   : > { %v3452_v1 = vpop.eup %2531  ;;  %v1294_v24 = vsub.f32 %v3360_v26, %v1256_v22  ;;  %v1295_v42 = vsub.f32 %v3362_v27, %v1256_v22  ;;  %v1386_v6 = vadd.f32 %v3450_v0, %v3448_v63  ;;  %v1493_v22 = vld [vmem:[#allocation4 + $0x38] sm:$0xff] }
 0x3ac   : > { %v3458_v2 = vpop.eup %2533  ;;  %v1259_v3 = vpop.xlane.xlu1 %1258  ;;  %2157 = vmatpush3.bf16.msra.mxu1 %v1493_v22 }
 0x3ad   : > { %v1342_v14 = vmul.f32 1.442695, %v1294_v24  ;;  %v1344_v17 = vmul.f32 1.442695, %v1295_v42  ;;  %v1296_v5 = vsub.f32 %v3364_v28, %v1259_v3  ;;  %v1297_v19 = vsub.f32 %v3368_v30, %v1259_v3  ;;  %1387 = vadd.xlane.f32.xlu0 %v1386_v6  ;;  %2270 = vmatprep.subr.bf16.mxu1 %v2503_v55 }
 0x3ae   : > { %v1389_v26 = vadd.f32 %v3458_v2, %v3452_v1 }
 0x3af   : > { %2543 = vpow2.f32 %v1342_v14  ;;  %v1346_v27 = vmul.f32 1.442695, %v1296_v5  ;;  %v1348_v23 = vmul.f32 1.442695, %v1297_v19 }
 0x3b0   : > { %2545 = vpow2.f32 %v1344_v17  ;;  %1390 = vadd.xlane.f32.xlu1 %v1389_v26 }
 0x3b1   : > { %v3464_v10 = vpop.eup %2535  ;;  %2547 = vpow2.f32 %v1346_v27 }
 0x3b2   : > { %v3466_v28 = vpop.eup %2537  ;;  %2549 = vpow2.f32 %v1348_v23  ;;  %v1262_v30 = vpop.xlane.xlu0 %1261 }
 0x3b3   : > { %v3468_v31 = vpop.eup %2539  ;;  %v1298_v11 = vsub.f32 %v3372_v32, %v1262_v30  ;;  %v1299_v13 = vsub.f32 %v3374_v33, %v1262_v30  ;;  %v1392_v37 = vadd.f32 %v3466_v28, %v3464_v10 }
 0x3b4   : > { %v3474_v15 = vpop.eup %2541  ;;  %v1265_v50 = vpop.xlane.xlu1 %1264 }
 0x3b5   : > { %v1350_v16 = vmul.f32 1.442695, %v1298_v11  ;;  %v1352_v44 = vmul.f32 1.442695, %v1299_v13  ;;  %v1300_v18 = vsub.f32 %v3376_v34, %v1265_v50  ;;  %v1301_v53 = vsub.f32 %v3380_v36, %v1265_v50  ;;  %1393 = vadd.xlane.f32.xlu0 %v1392_v37 }
 0x3b6   : > { %v1395_v32 = vadd.f32 %v3474_v15, %v3468_v31 }
 0x3b7   : > { %2551 = vpow2.f32 %v1350_v16  ;;  %v1354_v33 = vmul.f32 1.442695, %v1300_v18  ;;  %v1356_v54 = vmul.f32 1.442695, %v1301_v53 }
 0x3b8   : > { %2553 = vpow2.f32 %v1352_v44  ;;  %1396 = vadd.xlane.f32.xlu1 %v1395_v32 }
 0x3b9   : > { %v3480_v58 = vpop.eup %2543  ;;  %2555 = vpow2.f32 %v1354_v33 }
 0x3ba   : > { %v3482_v34 = vpop.eup %2545  ;;  %2557 = vpow2.f32 %v1356_v54  ;;  %v1268_v36 = vpop.xlane.xlu0 %1267 }
 0x3bb   : > { %v3484_v59 = vpop.eup %2547  ;;  %v1302_v60 = vsub.f32 %v3384_v38, %v1268_v36  ;;  %v1303_v62 = vsub.f32 %v3386_v39, %v1268_v36  ;;  %v1398_v20 = vadd.f32 %v3482_v34, %v3480_v58 }
 0x3bc   : > { %v3490_v24 = vpop.eup %2549  ;;  %v1271_v42 = vpop.xlane.xlu1 %1270 }
 0x3bd   : > { %v1358_v6 = vmul.f32 1.442695, %v1302_v60  ;;  %v1360_v8 = vmul.f32 1.442695, %v1303_v62  ;;  %v1304_v12 = vsub.f32 %v3388_v40, %v1271_v42  ;;  %v1305_v3 = vsub.f32 %v3392_v46, %v1271_v42  ;;  %1399 = vadd.xlane.f32.xlu0 %v1398_v20 }
 0x3be   : > { %v1401_v38 = vadd.f32 %v3490_v24, %v3484_v59 }
 0x3bf   : > { %2559 = vpow2.f32 %v1358_v6  ;;  %v1362_v39 = vmul.f32 1.442695, %v1304_v12  ;;  %v1364_v14 = vmul.f32 1.442695, %v1305_v3 }
 0x3c0   : > { %2561 = vpow2.f32 %v1360_v8  ;;  %1402 = vadd.xlane.f32.xlu1 %v1401_v38 }
 0x3c1   : > { %v3496_v17 = vpop.eup %2551  ;;  %2563 = vpow2.f32 %v1362_v39 }
 0x3c2   : > { %v3498_v5 = vpop.eup %2553  ;;  %2565 = vpow2.f32 %v1364_v14  ;;  %v1274_v19 = vpop.xlane.xlu0 %1273  ;;  %v2504_v14 = vld [vmem:[#allocation10 + $0x8] sm:$0xff]  }
 0x3c3   : > { %v3500_v40 = vpop.eup %2555  ;;  %v1306_v46 = vsub.f32 %v3396_v45, %v1274_v19  ;;  %v1307_v26 = vsub.f32 %v3398_v49, %v1274_v19  ;;  %v1404_v27 = vadd.f32 %v3498_v5, %v3496_v17 }
 0x3c4   : > { %v3506_v23 = vpop.eup %2557  ;;  %v1277_v29 = vpop.xlane.xlu1 %1276 }
 0x3c5   : > { %v1366_v9 = vmul.f32 1.442695, %v1306_v46  ;;  %v1368_v30 = vmul.f32 1.442695, %v1307_v26  ;;  %1405 = vadd.xlane.f32.xlu0 %v1404_v27  ;;  %v1308_v11 = vsub.f32 %v3400_v4, %v1277_v29  ;;  %v1309_v13 = vsub.f32 %v3404_v48, %v1277_v29 }
 0x3c6   : > { %v1407_v37 = vadd.f32 %v3506_v23, %v3500_v40 }
 0x3c7   : > { %2567 = vpow2.f32 %v1366_v9  ;;  %v1370_v45 = vmul.f32 1.442695, %v1308_v11  ;;  %v1372_v41 = vmul.f32 1.442695, %v1309_v13 }
 0x3c8   : > { %2569 = vpow2.f32 %v1368_v30  ;;  %1408 = vadd.xlane.f32.xlu1 %v1407_v37  ;;  %v2506_v30 = vld [vmem:[#allocation10 + $0x18] sm:$0xff]  }
 0x3c9   : > { %v3512_v49 = vpop.eup %2559  ;;  %2571 = vpow2.f32 %v1370_v45 }
 0x3ca   : > { %v3514_v43 = vpop.eup %2561  ;;  %2573 = vpow2.f32 %v1372_v41 }
 0x3cb   : > { %v3516_v50 = vpop.eup %2563  ;;  %v1410_v4 = vadd.f32 %v3514_v43, %v3512_v49 }
 0x3cc   : > { %v3520_v48 = vpop.eup %2565 }
 0x3cd   : > { %1411 = vadd.xlane.f32.xlu0 %v1410_v4  ;;  %v1413_v16 = vadd.f32 %v3520_v48, %v3516_v50 }
 0x3cf   : > { %1414 = vadd.xlane.f32.xlu1 %v1413_v16 }
 0x3d1   : > { %v3524_v44 = vpop.eup %2567 }
 0x3d2   : > { %v3526_v18 = vpop.eup %2569 }
 0x3d3   : > { %v3528_v53 = vpop.eup %2571  ;;  %v1416_v32 = vadd.f32 %v3526_v18, %v3524_v44 }
 0x3d4   : > { %v3532_v33 = vpop.eup %2573 }
 0x3d5   : > { %1417 = vadd.xlane.f32.xlu0 %v1416_v32  ;;  %v1419_v54 = vadd.f32 %v3532_v33, %v3528_v53 }
 0x3d7   : > { %1420 = vadd.xlane.f32.xlu1 %v1419_v54 }
 0x42a   : > { %v1376_v57 = vpop.xlane.xlu0 %1375 }
 0x42b   : > { %2575 = vrcp.f32 %v1376_v57 }
 0x42e   : > { %v1379_v36 = vpop.xlane.xlu1 %1378 }
 0x42f   : > { %2577 = vrcp.f32 %v1379_v36 }
 0x432   : > { %v1382_v60 = vpop.xlane.xlu0 %1381 }
 0x433   : > { %2579 = vrcp.f32 %v1382_v60 }
 0x435   : > { %v2576_v62 = vpop.eup %2575 }
 0x436   : > { %v1385_v20 = vpop.xlane.xlu1 %1384  ;;  %v1439_v21 = vmul.f32 %v2576_v62, %v3418_v25  ;;  %v1438_v22 = vmul.f32 %v2576_v62, %v3416_v7 }
 0x437   : > { %2581 = vrcp.f32 %v1385_v20 }
 0x438   : > { %1792 = vst [vmem:[%s3143_s9 + $0x8] sm:$0xff] %v1439_v21  ;;  %1791 = vst [vmem:[%s3143_s9] sm:$0xff] %v1438_v22 }
 0x439   : > { %v2578_v42 = vpop.eup %2577 }
 0x43a   : > { %v1388_v6 = vpop.xlane.xlu0 %1387  ;;  %v1441_v8 = vmul.f32 %v2578_v42, %v3428_v47  ;;  %v1440_v12 = vmul.f32 %v2578_v42, %v3424_v35  ;;  %v2505_v47 = vld [vmem:[#allocation10 + $0x10] sm:$0xff]  }
 0x43b   : > { %2583 = vrcp.f32 %v1388_v6 }
 0x43c   : > { %v1471_v3 = vpack.c.bf16 %v1441_v8, %v1439_v21  ;;  %1794 = vst [vmem:[%s3143_s9 + $0x18] sm:$0xff] %v1441_v8  ;;  %v1470_v38 = vpack.c.bf16 %v1440_v12, %v1438_v22  ;;  %1793 = vst [vmem:[%s3143_s9 + $0x10] sm:$0xff] %v1440_v12 }
 0x43d   : > { %v2580_v39 = vpop.eup %2579  ;;  %v1391_v25 = vpop.xlane.xlu1 %1390 }
 0x43e   : > { %2585 = vrcp.f32 %v1391_v25  ;;  %1534 = vmatprep.mubr.bf16.mxu1 %v1471_v3  ;;  %v1443_v7 = vmul.f32 %v2580_v39, %v3434_v52  ;;  %v1442_v19 = vmul.f32 %v2580_v39, %v3432_v51 }
 0x43f   : > { %1535 = vmatmul.mubr.bf16.vlgmr.msra.gmra.mrb[0].mxu1 %v1470_v38 }
 0x440   : > { %1796 = vst [vmem:[%s3143_s9 + $0x28] sm:$0xff] %v1443_v7  ;;  %1795 = vst [vmem:[%s3143_s9 + $0x20] sm:$0xff] %v1442_v19  ;;  %2271 = vmatpush3.bf16.msra.mxu1 %v2503_v55 }
 0x441   : > { %v2582_v35 = vpop.eup %2581  ;;  %2272 = vmatprep.subr.bf16.mxu1 %v2504_v14 }
 0x442   : > { %v1394_v46 = vpop.xlane.xlu0 %1393  ;;  %v1445_v26 = vmul.f32 %v2582_v35, %v3444_v61  ;;  %v1444_v27 = vmul.f32 %v2582_v35, %v3440_v56 }
 0x443   : > { %2587 = vrcp.f32 %v1394_v46 }
 0x444   : > { %v1473_v29 = vpack.c.bf16 %v1445_v26, %v1443_v7  ;;  %1798 = vst [vmem:[%s3143_s9 + $0x38] sm:$0xff] %v1445_v26  ;;  %v1472_v52 = vpack.c.bf16 %v1444_v27, %v1442_v19  ;;  %1797 = vst [vmem:[%s3143_s9 + $0x30] sm:$0xff] %v1444_v27  ;;  %2273 = vmatpush3.bf16.msra.mxu1 %v2504_v14 }
 0x445   : > { %v2584_v51 = vpop.eup %2583  ;;  %v1397_v9 = vpop.xlane.xlu1 %1396  ;;  %2274 = vmatprep.subr.bf16.mxu1 %v2505_v47 }
 0x446   : > { %2589 = vrcp.f32 %v1397_v9  ;;  %1542 = vmatprep.mubr.bf16.mxu1 %v1473_v29  ;;  %v1447_v61 = vmul.f32 %v2584_v51, %v3450_v0  ;;  %v1446_v56 = vmul.f32 %v2584_v51, %v3448_v63  ;;  %v2507_v29 = vld [vmem:[#allocation10 + $0x20] sm:$0xff]  }
 0x447   : > { %1543 = vmatmul.mubr.bf16.gmra.mrb[4].mxu1 %v1472_v52 }
 0x448   : > { %v2586_v11 = vpop.eup %2585  ;;  %1800 = vst [vmem:[%s3143_s9 + $0x48] sm:$0xff] %v1447_v61  ;;  %1799 = vst [vmem:[%s3143_s9 + $0x40] sm:$0xff] %v1446_v56  ;;  %2275 = vmatpush3.bf16.msra.mxu1 %v2505_v47 }
 0x449   : > { %v1449_v13 = vmul.f32 %v2586_v11, %v3458_v2  ;;  %v1448_v37 = vmul.f32 %v2586_v11, %v3452_v1  ;;  %2276 = vmatprep.subr.bf16.mxu1 %v2506_v30 }
 0x44a   : > { %v1400_v45 = vpop.xlane.xlu0 %1399 }
 0x44b   : > { %2591 = vrcp.f32 %v1400_v45  ;;  %v1475_v41 = vpack.c.bf16 %v1449_v13, %v1447_v61  ;;  %1802 = vst [vmem:[%s3143_s9 + $0x58] sm:$0xff] %v1449_v13  ;;  %1801 = vst [vmem:[%s3143_s9 + $0x50] sm:$0xff] %v1448_v37  ;;  %v1474_v4 = vpack.c.bf16 %v1448_v37, %v1446_v56 }
 0x44c   : > { %2277 = vmatpush3.bf16.msra.mxu1 %v2506_v30 }
 0x44d   : > { %v2588_v0 = vpop.eup %2587  ;;  %1550 = vmatprep.mubr.bf16.mxu1 %v1475_v41  ;;  %v1403_v63 = vpop.xlane.xlu1 %1402  ;;  %2278 = vmatprep.subr.bf16.mxu1 %v2507_v29 }
 0x44e   : > { %2593 = vrcp.f32 %v1403_v63  ;;  %v1451_v2 = vmul.f32 %v2588_v0, %v3466_v28  ;;  %v1450_v1 = vmul.f32 %v2588_v0, %v3464_v10 }
 0x44f   : > { %1551 = vmatmul.mubr.bf16.gmra.mrb[8].mxu1 %v1474_v4 }
 0x450   : > { %v2590_v16 = vpop.eup %2589  ;;  %1804 = vst [vmem:[%s3143_s9 + $0x68] sm:$0xff] %v1451_v2  ;;  %1803 = vst [vmem:[%s3143_s9 + $0x60] sm:$0xff] %v1450_v1  ;;  %2279 = vmatpush3.bf16.msra.mxu1 %v2507_v29 }
 0x451   : > { %v1453_v32 = vmul.f32 %v2590_v16, %v3474_v15  ;;  %v1452_v54 = vmul.f32 %v2590_v16, %v3468_v31 }
 0x452   : > { %v1406_v55 = vpop.xlane.xlu0 %1405 }
 0x453   : > { %2595 = vrcp.f32 %v1406_v55  ;;  %v1477_v57 = vpack.c.bf16 %v1453_v32, %v1451_v2  ;;  %1806 = vst [vmem:[%s3143_s9 + $0x78] sm:$0xff] %v1453_v32  ;;  %1805 = vst [vmem:[%s3143_s9 + $0x70] sm:$0xff] %v1452_v54  ;;  %v1476_v28 = vpack.c.bf16 %v1452_v54, %v1450_v1 }
 0x455   : > { %v2592_v36 = vpop.eup %2591  ;;  %1558 = vmatprep.mubr.bf16.mxu1 %v1477_v57  ;;  %v1409_v10 = vpop.xlane.xlu1 %1408 }
 0x456   : > { %2597 = vrcp.f32 %v1409_v10  ;;  %v1455_v60 = vmul.f32 %v2592_v36, %v3482_v34  ;;  %v1454_v15 = vmul.f32 %v2592_v36, %v3480_v58 }
 0x457   : > { %1559 = vmatmul.mubr.bf16.gmra.mrb[12].mxu1 %v1476_v28 }
 0x458   : > { %v2594_v62 = vpop.eup %2593  ;;  %1808 = vst [vmem:[%s3143_s9 + $0x88] sm:$0xff] %v1455_v60  ;;  %1807 = vst [vmem:[%s3143_s9 + $0x80] sm:$0xff] %v1454_v15 }
 0x459   : > { %v1457_v31 = vmul.f32 %v2594_v62, %v3490_v24  ;;  %v1456_v20 = vmul.f32 %v2594_v62, %v3484_v59 }
 0x45a   : > { %v1412_v21 = vpop.xlane.xlu0 %1411 }
 0x45b   : > { %2599 = vrcp.f32 %v1412_v21  ;;  %v1479_v22 = vpack.c.bf16 %v1457_v31, %v1455_v60  ;;  %1810 = vst [vmem:[%s3143_s9 + $0x98] sm:$0xff] %v1457_v31  ;;  %1809 = vst [vmem:[%s3143_s9 + $0x90] sm:$0xff] %v1456_v20  ;;  %v1478_v58 = vpack.c.bf16 %v1456_v20, %v1454_v15 }
 0x45c   : > { %v1415_v42 = vpop.xlane.xlu1 %1414 }
 0x45d   : > { %v2596_v34 = vpop.eup %2595  ;;  %1566 = vmatprep.mubr.bf16.mxu1 %v1479_v22  ;;  %2601 = vrcp.f32 %v1415_v42 }
 0x45e   : > { %v1459_v6 = vmul.f32 %v2596_v34, %v3498_v5  ;;  %v1458_v24 = vmul.f32 %v2596_v34, %v3496_v17 }
 0x45f   : > { %1567 = vmatmul.mubr.bf16.gmra.mrb[16].mxu1 %v1478_v58 }
 0x460   : > { %v2598_v8 = vpop.eup %2597  ;;  %1812 = vst [vmem:[%s3143_s9 + $0xa8] sm:$0xff] %v1459_v6  ;;  %1811 = vst [vmem:[%s3143_s9 + $0xa0] sm:$0xff] %v1458_v24 }
 0x461   : > { %v1461_v59 = vmul.f32 %v2598_v8, %v3506_v23  ;;  %v1460_v12 = vmul.f32 %v2598_v8, %v3500_v40 }
 0x462   : > { %v1418_v3 = vpop.xlane.xlu0 %1417 }
 0x463   : > { %2603 = vrcp.f32 %v1418_v3  ;;  %v1481_v38 = vpack.c.bf16 %v1461_v59, %v1459_v6  ;;  %1814 = vst [vmem:[%s3143_s9 + $0xb8] sm:$0xff] %v1461_v59  ;;  %1813 = vst [vmem:[%s3143_s9 + $0xb0] sm:$0xff] %v1460_v12  ;;  %v1480_v17 = vpack.c.bf16 %v1460_v12, %v1458_v24 }
 0x464   : > { %v1421_v5 = vpop.xlane.xlu1 %1420 }
 0x465   : > { %v2600_v39 = vpop.eup %2599  ;;  %1574 = vmatprep.mubr.bf16.mxu1 %v1481_v38  ;;  %2605 = vrcp.f32 %v1421_v5 }
 0x466   : > { %v1463_v25 = vmul.f32 %v2600_v39, %v3514_v43  ;;  %v1462_v23 = vmul.f32 %v2600_v39, %v3512_v49 }
 0x467   : > { %v2602_v14 = vpop.eup %2601  ;;  %1575 = vmatmul.mubr.bf16.gmra.mrb[20].mxu1 %v1480_v17 }
 0x468   : > { %v1465_v40 = vmul.f32 %v2602_v14, %v3520_v48  ;;  %1816 = vst [vmem:[%s3143_s9 + $0xc8] sm:$0xff] %v1463_v25  ;;  %v1464_v7 = vmul.f32 %v2602_v14, %v3516_v50  ;;  %1815 = vst [vmem:[%s3143_s9 + $0xc0] sm:$0xff] %v1462_v23 }
 0x46a   : > { %v1483_v19 = vpack.c.bf16 %v1465_v40, %v1463_v25  ;;  %1818 = vst [vmem:[%s3143_s9 + $0xd8] sm:$0xff] %v1465_v40  ;;  %1817 = vst [vmem:[%s3143_s9 + $0xd0] sm:$0xff] %v1464_v7  ;;  %v1482_v43 = vpack.c.bf16 %v1464_v7, %v1462_v23 }
 0x46c   : > { %1582 = vmatprep.mubr.bf16.mxu1 %v1483_v19 }
 0x46d   : > { %v2604_v35 = vpop.eup %2603 }
 0x46e   : > { %v1467_v49 = vmul.f32 %v2604_v35, %v3526_v18  ;;  %v1466_v47 = vmul.f32 %v2604_v35, %v3524_v44  ;;  %v2508_v18 = vld [vmem:[#allocation10 + $0x28] sm:$0xff]   ;;  %v2509_v44 = vld [vmem:[#allocation10 + $0x30] sm:$0xff]  }
 0x46f   : > { %v2606_v46 = vpop.eup %2605  ;;  %1583 = vmatmul.mubr.bf16.gmra.mrb[24].mxu1 %v1482_v43  ;;  %2280 = vmatprep.subr.bf16.mxu1 %v2508_v18 }
 0x470   : > { %v1469_v48 = vmul.f32 %v2606_v46, %v3532_v33  ;;  %1820 = vst [vmem:[%s3143_s9 + $0xe8] sm:$0xff] %v1467_v49  ;;  %v1468_v50 = vmul.f32 %v2606_v46, %v3528_v53  ;;  %1819 = vst [vmem:[%s3143_s9 + $0xe0] sm:$0xff] %v1466_v47  ;;  %2281 = vmatpush3.bf16.msra.mxu1 %v2508_v18  ;;  %v2510_v33 = vld [vmem:[#allocation10 + $0x38] sm:$0xff]  }
 0x471   : > { %2282 = vmatprep.subr.bf16.mxu1 %v2509_v44 }
 0x472   : > { %v1485_v26 = vpack.c.bf16 %v1469_v48, %v1467_v49  ;;  %1822 = vst [vmem:[%s3143_s9 + $0xf8] sm:$0xff] %v1469_v48  ;;  %1821 = vst [vmem:[%s3143_s9 + $0xf0] sm:$0xff] %v1468_v50  ;;  %v1484_v27 = vpack.c.bf16 %v1468_v50, %v1466_v47  ;;  %s2697_s9 = sshll.u32 %s2861_s17, 4  ;;  %s2698_s9 = int_to_ptr.vmem [resolvable:$false] %s2697_s9 }
 0x473   : > { %s2699_s6 = scalar_lea.vmem %s2698_s9, 8192  ;;  %p2700_p9 = scmp.lt.s32.totalorder %s3603_s24, %s2698_s9 }
 0x474   : > { %1590 = vmatprep.mubr.bf16.mxu1 %v1485_v26  ;;  %2283 = vmatpush3.bf16.msra.mxu1 %v2509_v44  ;;  %p2701_p11 = scmp.lt.s32.totalorder %s2699_s6, %s2693_s20 }
 0x475   : > { %2284 = vmatprep.subr.bf16.mxu1 %v2510_v33 }
 0x476   : > { %p2702_p5 = por %p2701_p11, %p2700_p9 }
 0x477   : > { %1591 = vmatmul.mubr.bf16.gmra.mrb[28].mxu1 %v1484_v27 }
 0x478   : > { %2285 = vmatpush3.bf16.msra.mxu1 %v2510_v33  ;;  %p2703_p8 = pnand %p2702_p5, %p2696_p7 }
 0x512   : > { %v2158_v53 = vpop.f32.mrb[0].mxu1 }
 0x513   : > { %v2159_v52 = vpop.f32.mrb[1].mxu1 }
 0x514   : > { %v2160_v51 = vadd.f32 %v2159_v52, %v2158_v53  ;;  %v2161_v9 = vpop.f32.mrb[2].mxu1 }
 0x515   : > { %v2162_v30 = vpop.f32.mrb[3].mxu1 }
 0x516   : > { %v2163_v61 = vadd.f32 %v2162_v30, %v2161_v9 }
 0x518   : > { %v1599_v56 = vpack.c.bf16 %v2163_v61, %v2160_v51 }
 0x51a   : > { %v2164_v11 = vpop.f32.mrb[4].mxu1  ;;  %2286 = vmatprep.mubr.bf16.mxu1 %v1599_v56 }
 0x51b   : > { %v2165_v13 = vpop.f32.mrb[5].mxu1 }
 0x51c   : > { %v2166_v37 = vadd.f32 %v2165_v13, %v2164_v11  ;;  %v2167_v45 = vpop.f32.mrb[6].mxu1 }
 0x51d   : > { %v2168_v41 = vpop.f32.mrb[7].mxu1 }
 0x51e   : > { %v2169_v0 = vadd.f32 %v2168_v41, %v2167_v45 }
 0x520   : > { %v1600_v63 = vpack.c.bf16 %v2169_v0, %v2166_v37 }
 0x522   : > { %v2170_v4 = vpop.f32.mrb[8].mxu1  ;;  %2287 = vmatmul.mubr.bf16.vlgmr.msra.gmra.mrb[32].mxu1 %v1600_v63 }
 0x523   : > { %v2171_v2 = vpop.f32.mrb[9].mxu1 }
 0x524   : > { %v2172_v1 = vadd.f32 %v2171_v2, %v2170_v4  ;;  %v2173_v16 = vpop.f32.mrb[10].mxu1 }
 0x525   : > { %v2174_v32 = vpop.f32.mrb[11].mxu1 }
 0x526   : > { %v2175_v54 = vadd.f32 %v2174_v32, %v2173_v16 }
 0x528   : > { %v1601_v55 = vpack.c.bf16 %v2175_v54, %v2172_v1 }
 0x52a   : > { %v2176_v57 = vpop.f32.mrb[12].mxu1  ;;  %2290 = vmatprep.mubr.bf16.mxu1 %v1601_v55 }
 0x52b   : > { %v2177_v36 = vpop.f32.mrb[13].mxu1 }
 0x52c   : > { %v2178_v10 = vadd.f32 %v2177_v36, %v2176_v57  ;;  %v2179_v28 = vpop.f32.mrb[14].mxu1 }
 0x52d   : > { %v2180_v60 = vpop.f32.mrb[15].mxu1 }
 0x52e   : > { %v2181_v15 = vadd.f32 %v2180_v60, %v2179_v28 }
 0x530   : > { %v1602_v62 = vpack.c.bf16 %v2181_v15, %v2178_v10 }
 0x532   : > { %v2182_v31 = vpop.f32.mrb[16].mxu1  ;;  %2291 = vmatmul.mubr.bf16.gmra.mrb[36].mxu1 %v1602_v62 }
 0x533   : > { %v2183_v20 = vpop.f32.mrb[17].mxu1 }
 0x534   : > { %v2184_v21 = vadd.f32 %v2183_v20, %v2182_v31  ;;  %v2185_v22 = vpop.f32.mrb[18].mxu1 }
 0x535   : > { %v2186_v42 = vpop.f32.mrb[19].mxu1 }
 0x536   : > { %v2187_v34 = vadd.f32 %v2186_v42, %v2185_v22 }
 0x538   : > { %v1603_v58 = vpack.c.bf16 %v2187_v34, %v2184_v21 }
 0x53a   : > { %v2188_v6 = vpop.f32.mrb[20].mxu1  ;;  %2294 = vmatprep.mubr.bf16.mxu1 %v1603_v58 }
 0x53b   : > { %v2189_v24 = vpop.f32.mrb[21].mxu1 }
 0x53c   : > { %v2190_v8 = vadd.f32 %v2189_v24, %v2188_v6  ;;  %v2191_v59 = vpop.f32.mrb[22].mxu1 }
 0x53d   : > { %v2192_v12 = vpop.f32.mrb[23].mxu1 }
 0x53e   : > { %v2193_v3 = vadd.f32 %v2192_v12, %v2191_v59 }
 0x540   : > { %v1604_v38 = vpack.c.bf16 %v2193_v3, %v2190_v8 }
 0x542   : > { %v2194_v5 = vpop.f32.mrb[24].mxu1  ;;  %2295 = vmatmul.mubr.bf16.gmra.mrb[40].mxu1 %v1604_v38 }
 0x543   : > { %v2195_v39 = vpop.f32.mrb[25].mxu1 }
 0x544   : > { %v2196_v17 = vadd.f32 %v2195_v39, %v2194_v5  ;;  %v2197_v25 = vpop.f32.mrb[26].mxu1 }
 0x545   : > { %v2198_v23 = vpop.f32.mrb[27].mxu1 }
 0x546   : > { %v2199_v14 = vadd.f32 %v2198_v23, %v2197_v25 }
 0x548   : > { %v1605_v40 = vpack.c.bf16 %v2199_v14, %v2196_v17 }
 0x54a   : > { %v2200_v7 = vpop.f32.mrb[28].mxu1  ;;  %2298 = vmatprep.mubr.bf16.mxu1 %v1605_v40 }
 0x54b   : > { %v2201_v19 = vpop.f32.mrb[29].mxu1 }
 0x54c   : > { %v2202_v35 = vadd.f32 %v2201_v19, %v2200_v7  ;;  %v2203_v43 = vpop.f32.mrb[30].mxu1 }
 0x54d   : > { %v2204_v49 = vpop.f32.mrb[31].mxu1 }
 0x54e   : > { %v2205_v47 = vadd.f32 %v2204_v49, %v2203_v43 }
 0x550   : > { %v1606_v46 = vpack.c.bf16 %v2205_v47, %v2202_v35 }
 0x552   : > { %2299 = vmatmul.mubr.bf16.gmra.mrb[44].mxu1 %v1606_v46 }
 0x553   : > { %2706 = shalt.err (!%p2703_p8)
}
 0x554   : > { %s2707_s11 = scalar_lea.hbm %s3608_s10, 4096  ;;  %s2711_s18 = scalar_lea.hbm %s3769_s4, 16384 }
 0x555   : > { %p2708_p12 = scmp.ne.s32.totalorder %s3608_s10, %s2707_s11  ;;  %p2712_p10 = scmp.lt.u32.totalorder %s3608_s10, %s3769_s4 }
 0x556   : > { %p2713_p0 = scmp.lt.u32.totalorder %s2711_s18, %s2707_s11  ;;  %p2715_p1 = scmp.lt.u32.totalorder %s2707_s11, %s3608_s10 }
 0x557   : > { %p2709_p2 = pnand %p2708_p12, %p3770_p3 }
 0x558   : > { %p2714_p4 = por %p2713_p0, %p2712_p10 }
 0x559   : > { %p2710_p6 = pneg %p2709_p2 }
 0x55a   : > { %p2716_p13 = por %p2715_p1, %p2714_p4 }
 0x55c   : > { %p2717_p7 = pnand %p2716_p13, %p2710_p6 }
 0x55e   : > { %2720 = shalt.err (!%p2717_p7)
}
 0x55f   : > { %s2862_s15 = smov 256   ;;  %s2863_s20 = smov 16  }
 0x560   : > { %2329 = dma.vmem_to_hbm [thread:$0]  (%p3770_p3), %s3603_s24, 4096, %s3608_s10, %s1829_s12, %s2862_s15, %s2862_s15, %s2863_s20  }
 0x561   : > { %s3771_s6 = sld [smem:[#allocation24_spill]]  ;;  %s2075_s24 = sshll.u32 %s2835_s27, 4 }
 0x562   : > { %s2076_s10 = sshll.u32 %s2839_s28, 5  ;;  %s1844_s14 = sshll.u32 %s3141_s8, 4  ;;  %s3658_s14 = int_to_ptr.vmem [resolvable:$true] %s1844_s14 }
 0x563   : > { %s1841_s12 = sadd.s32 %s2076_s10, %s2075_s24  ;;  %s3772_s16 = sld [smem:[#allocation25_spill]] }
 0x564   : > { %s2077_s11 = sshll.u32 %s1841_s12, 7  ;;  %s1824_s28 = scalar_lea.sflag [#allocation7], %s3137_s29 }
 0x565   : > { %s2721_s19 = scalar_lea.vmem %s3658_s14, 2048  ;;  %s2864_s15 = smov [#allocation11]  }
 0x566   : > { %p2722_p9 = scmp.ne.s32.totalorder %s3658_s14, %s2721_s19  ;;  %s2725_s20 = sshll.u32 %s2864_s15, 4  ;;  %s2726_s20 = int_to_ptr.vmem [resolvable:$false] %s2725_s20 }
 0x567   : > { %v2064_v48 = vld [vmem:[%s3771_s6] ss:$0 sm:$0xff]  ;;  %s2727_s17 = scalar_lea.vmem %s2726_s20, 4096  ;;  %p2728_p8 = scmp.lt.s32.totalorder %s3658_s14, %s2726_s20 }
 0x568   : > { %p2723_p11 = pnand %p2722_p9, %p3770_p3  ;;  %p2729_p12 = scmp.lt.s32.totalorder %s2727_s17, %s2721_s19 }
 0x569   : > { %s3656_s27 = scalar_lea.hbm %s3772_s16, %s2077_s11 }
 0x56a   : > { %p2724_p5 = pneg %p2723_p11  ;;  %p2730_p2 = por %p2729_p12, %p2728_p8 }
 0x56c   : > { %p2731_p6 = pnand %p2730_p2, %p2724_p5 }
 0x5f5   : > { %v2288_v50 = vpop.f32.mrb[32].mxu1 }
 0x5f6   : > { %v1721_v26 = vadd.f32 %v2288_v50, %v2064_v48  ;;  %v1712_v27 = vpop.f32.mrb[33].mxu1 }
 0x5f7   : > { %v1713_v29 = vadd.f32 %v2064_v48, %v1712_v27  ;;  %v2289_v18 = vpop.f32.mrb[34].mxu1 }
 0x5f8   : > { %1777 = vst [vmem:[%s3141_s8 + $0x10] sm:$0xff] %v1721_v26  ;;  %v1724_v44 = vadd.f32 %v2289_v18, %v2064_v48  ;;  %v1715_v33 = vpop.f32.mrb[35].mxu1 }
 0x5f9   : > { %1775 = vst [vmem:[%s3141_s8] sm:$0xff] %v1713_v29  ;;  %v1716_v53 = vadd.f32 %v2064_v48, %v1715_v33 }
 0x5fa   : > { %1778 = vst [vmem:[%s3141_s8 + $0x18] sm:$0xff] %v1724_v44 }
 0x5fb   : > { %1776 = vst [vmem:[%s3141_s8 + $0x8] sm:$0xff] %v1716_v53 }
 0x605   : > { %v2292_v52 = vpop.f32.mrb[36].mxu1 }
 0x606   : > { %v1737_v51 = vadd.f32 %v2292_v52, %v2064_v48  ;;  %v1728_v9 = vpop.f32.mrb[37].mxu1 }
 0x607   : > { %v1729_v30 = vadd.f32 %v2064_v48, %v1728_v9  ;;  %v2293_v61 = vpop.f32.mrb[38].mxu1 }
 0x608   : > { %1781 = vst [vmem:[%s3141_s8 + $0x30] sm:$0xff] %v1737_v51  ;;  %v1740_v56 = vadd.f32 %v2293_v61, %v2064_v48  ;;  %v1731_v11 = vpop.f32.mrb[39].mxu1 }
 0x609   : > { %1779 = vst [vmem:[%s3141_s8 + $0x20] sm:$0xff] %v1729_v30  ;;  %v1732_v13 = vadd.f32 %v2064_v48, %v1731_v11 }
 0x60a   : > { %1782 = vst [vmem:[%s3141_s8 + $0x38] sm:$0xff] %v1740_v56 }
 0x60b   : > { %1780 = vst [vmem:[%s3141_s8 + $0x28] sm:$0xff] %v1732_v13 }
 0x615   : > { %v2296_v37 = vpop.f32.mrb[40].mxu1 }
 0x616   : > { %v1753_v45 = vadd.f32 %v2296_v37, %v2064_v48  ;;  %v1744_v41 = vpop.f32.mrb[41].mxu1 }
 0x617   : > { %v1745_v0 = vadd.f32 %v2064_v48, %v1744_v41  ;;  %v2297_v63 = vpop.f32.mrb[42].mxu1 }
 0x618   : > { %1785 = vst [vmem:[%s3141_s8 + $0x50] sm:$0xff] %v1753_v45  ;;  %v1756_v4 = vadd.f32 %v2297_v63, %v2064_v48  ;;  %v1747_v2 = vpop.f32.mrb[43].mxu1 }
 0x619   : > { %1783 = vst [vmem:[%s3141_s8 + $0x40] sm:$0xff] %v1745_v0  ;;  %v1748_v1 = vadd.f32 %v2064_v48, %v1747_v2 }
 0x61a   : > { %1786 = vst [vmem:[%s3141_s8 + $0x58] sm:$0xff] %v1756_v4 }
 0x61b   : > { %1784 = vst [vmem:[%s3141_s8 + $0x48] sm:$0xff] %v1748_v1 }
 0x625   : > { %v2300_v16 = vpop.f32.mrb[44].mxu1 }
 0x626   : > { %v1769_v32 = vadd.f32 %v2300_v16, %v2064_v48  ;;  %v1760_v54 = vpop.f32.mrb[45].mxu1 }
 0x627   : > { %v1761_v55 = vadd.f32 %v2064_v48, %v1760_v54  ;;  %v2301_v57 = vpop.f32.mrb[46].mxu1 }
 0x628   : > { %1789 = vst [vmem:[%s3141_s8 + $0x70] sm:$0xff] %v1769_v32  ;;  %v1772_v36 = vadd.f32 %v2301_v57, %v2064_v48  ;;  %v1763_v10 = vpop.f32.mrb[47].mxu1 }
 0x629   : > { %1787 = vst [vmem:[%s3141_s8 + $0x60] sm:$0xff] %v1761_v55  ;;  %v1764_v28 = vadd.f32 %v2064_v48, %v1763_v10 }
 0x62a   : > { %1790 = vst [vmem:[%s3141_s8 + $0x78] sm:$0xff] %v1772_v36 }
 0x62b   : > { %1788 = vst [vmem:[%s3141_s8 + $0x68] sm:$0xff] %v1764_v28 }
 0x62c   : > { %2734 = shalt.err (!%p2731_p6)
}
 0x62d   : > { %s2735_s8 = scalar_lea.hbm %s3656_s27, 2048  ;;  %s2739_s24 = scalar_lea.hbm %s3772_s16, 8192 }
 0x62e   : > { %p2736_p10 = scmp.ne.s32.totalorder %s3656_s27, %s2735_s8  ;;  %p2740_p1 = scmp.lt.u32.totalorder %s3656_s27, %s3772_s16 }
 0x62f   : > { %p2741_p13 = scmp.lt.u32.totalorder %s2739_s24, %s2735_s8  ;;  %p2743_p9 = scmp.lt.u32.totalorder %s2735_s8, %s3656_s27 }
 0x630   : > { %p2737_p0 = pnand %p2736_p10, %p3770_p3 }
 0x631   : > { %p2742_p7 = por %p2741_p13, %p2740_p1 }
 0x632   : > { %p2738_p4 = pneg %p2737_p0 }
 0x633   : > { %p2744_p11 = por %p2743_p9, %p2742_p7 }
 0x635   : > { %p2745_p5 = pnand %p2744_p11, %p2738_p4 }
 0x637   : > { %2748 = shalt.err (!%p2745_p5)
}
 0x638   : > { %s2865_s11 = smov 128   ;;  %s2866_s1 = smov 8  }
 0x639   : > { %2328 = dma.vmem_to_hbm [thread:$0]  (%p3770_p3), %s3658_s14, 2048, %s3656_s27, %s1824_s28, %s2865_s11, %s2865_s11, %s2866_s1  }
 0x63a PF: > { %s3773_s18 = sld [smem:[#allocation18_spill]]  ;;  %s3774_s19 = sld [smem:[#allocation20_spill]] }
 0x63b   : > { %p2355_p8 = scmp.ge.s32.totalorder %s2851_s7, 2 }
 0x640   : > { %s1878_s15 = sand.u32 1, %s3773_s18   ;;  %p3775_p12 = scmp.ne.s32.totalorder %s3774_s19, 0 }
 0x641   : > { %s1879_s20 = scalar_lea.sflag [#allocation7], %s1878_s15 }
 0x642   : > { %p2344_p2 = pnand %p2355_p8, %p3775_p12 }
 0x644   : > { %2802 = dma.done.wait (!%p2344_p2), %s1879_s20, 2048  }
 0x645   : > { %2804 = vsyncadd (!%p2344_p2), %s1879_s20, 4294965248  ;;  %s1888_s17 = scalar_lea.sflag [#allocation13], %s1878_s15 }
 0x646   : > { %2806 = dma.done.wait (!%p2344_p2), %s1888_s17, 4096  }
 0x647   : > { %2808 = vsyncadd (!%p2344_p2), %s1888_s17, 4294963200  ;;  %s27_s7 = sadd.s32 1, %s2851_s7   ;;  %s3776_s27 = sld [smem:[#allocation19_spill]] }
 0x648   : > { %p24_p6 = scmp.ge.s32.totalorder %s27_s7, 6   ;;  %s3777_s29 = sld [smem:[#allocation21_spill]] }
 0x649   : > { %s3778_s13 = smov %s3792_s21  ;;  %s3779_s21 = smov %s2815_s22 }
 0x64a   : > { %s3780_s22 = smov %s2819_s23  ;;  %s3781_s23 = smov %s3080_s3 }
 0x64b   : > { %s3782_s24 = smov %s2827_s25  ;;  %s3783_s25 = smov %s2831_s26 }
 0x64c   : > { %s3784_s26 = smov %s3075_s5  ;;  %s3785_s28 = smov %s2847_s30 }
 0x64d   : > { %s3786_s30 = smov %s3778_s13  ;;  %26 = sbr.rel (!%p24_p6) target bundleno = 18 (0x12), region = 115 }
 0x654   :  { %1893 = vsyncpa [#allocation6], 1 }
 0x655   :  { %1895 = vsyncpa [#allocation6 + $0x1], 1 }
 0x656   :  { %1896 = vsyncpa [#allocation9], 1 }
 0x657   :  { %1897 = vsyncpa [#allocation7], 1 }
 0x658   :  { %1899 = vsyncpa [#allocation7 + $0x1], 1 }
 0x659   :  { %1900 = vsyncpa [#allocation13], 1 }
 0x65a   :  { %1902 = vsyncpa [#allocation13 + $0x1], 1 }

</bundles_post_ra>
